<compile_context>
chip_gen: v5e
topology: v5e:2x2
jax: 0.10.0
libtpu: 0.0.40
codegen_flags: <defaults>
</compile_context>

<pallas_src>
import functools

import jax
import jax.numpy as jnp
from jax.experimental import pallas as pl
from jax.experimental.pallas import tpu as pltpu

EPS = 1e-5  # nn.BatchNorm2d default eps

_COMPILER_PARAMS = pltpu.CompilerParams(
    dimension_semantics=("parallel",),     # token-tile axis -> megacore on v7x
    vmem_limit_bytes=48 * 1024 * 1024,     # stay well under v7x's 64 MiB VMEM
)


def _pick_tile(T, want):
    """Largest token tile <= `want` that divides T (multiple of 8 preferred)."""
    want = max(8, min(want, T))
    for cand in (want, 2048, 1024, 512, 256, 128, 64, 32, 16, 8):
        if cand <= want and T % cand == 0:
            return cand
    return T  # fall back to a single tile


# --------------------------- Pallas kernels (attention gate) ------------------

def _stats_kernel(g_ref, x_ref, wg_ref, wx_ref, sg_ref, qg_ref, sx_ref, qx_ref):
    # Pass 1: per-tile partial sum / sum-of-squares of the bias-free 1x1 conv
    # outputs (the conv bias shifts the mean only; it is added back outside and
    # ultimately cancels against the BN mean subtraction).  bf16 MXU, f32 acc.
    yg = jnp.dot(g_ref[...], wg_ref[...], preferred_element_type=jnp.float32)
    yx = jnp.dot(x_ref[...], wx_ref[...], preferred_element_type=jnp.float32)
    sg_ref[...] = jnp.sum(yg, axis=0, keepdims=True)[None]
    qg_ref[...] = jnp.sum(yg * yg, axis=0, keepdims=True)[None]
    sx_ref[...] = jnp.sum(yx, axis=0, keepdims=True)[None]
    qx_ref[...] = jnp.sum(yx * yx, axis=0, keepdims=True)[None]


def _apply_kernel(g_ref, x_ref, wg_ref, wx_ref, shift_ref, wp_ref, p_ref):
    # Pass 2: BN1 affine folded into the weights ->
    #   h = relu(g @ Wg_eff + x @ Wx_eff + shift)
    # (two accumulating MXU calls into one f32 tile instead of a single K=2C call
    # so no in-kernel lane-dim concat is needed; same MACs, g1/x1 never
    # materialize).  Then the psi 1x1 conv (C2 -> 1) as a VPU multiply + lane
    # reduction instead of an N=1 MXU matmul.
    h = jnp.dot(g_ref[...], wg_ref[...], preferred_element_type=jnp.float32)
    h = h + jnp.dot(x_ref[...], wx_ref[...], preferred_element_type=jnp.float32)
    h = jnp.maximum(h + shift_ref[...], 0.0)
    p_ref[...] = jnp.sum(h * wp_ref[...], axis=-1, keepdims=True)


def _gate_kernel(x_ref, p_ref, a_ref, c_ref, o_ref):
    # Pass 3: psi = sigmoid(a * p + c)  (psi-BN folded to scale/shift), then
    # out = x * psi.  sigmoid lowers to the EUP.
    psi = jax.nn.sigmoid(p_ref[...] * a_ref[0, 0] + c_ref[0, 0])
    o_ref[...] = (x_ref[...].astype(jnp.float32) * psi).astype(o_ref.dtype)


def attention_block_nhwc(g, x, params, *, tile_t=512):
    """AttentionBlock forward (training-mode BatchNorm) on NHWC inputs.

    g, x: (N, H, W, C).  Returns x * psi, same shape/dtype as x.
    tile_t: token-tile rows; sweep 512-2048 on v6e (128 MiB VMEM), the default
    512 stays comfortably inside the 48 MiB budget used for v7x.
    """
    (wg, bg, gam_g, bet_g,
     wx, bx, gam_x, bet_x,
     wp, bp, gam_p, bet_p) = params

    N, H, W, C = x.shape
    C2 = wg.shape[1]
    T = N * H * W
    tile = _pick_tile(T, tile_t)
    nt = T // tile

    # NHWC -> (T, C) is a free leading-dim merge: no transpose, no HBM copy.
    x_hp = x.reshape(T, C)
    g_bf = g.reshape(T, C).astype(jnp.bfloat16)   # bf16 streams for the MXU
    x_bf = x_hp.astype(jnp.bfloat16)

    row_spec = pl.BlockSpec((tile, C), lambda i: (i, 0))
    stat_spec = pl.BlockSpec((1, 1, C2), lambda i: (i, 0, 0))

    def _full(shape):
        return pl.BlockSpec(shape, lambda i: tuple(0 for _ in shape))

    # ---- pass 1: global BN statistics of the two 1x1 convs (two-pass BN) ----
    stat_shape = jax.ShapeDtypeStruct((nt, 1, C2), jnp.float32)
    sg, qg, sx, qx = pl.pallas_call(
        _stats_kernel,
        out_shape=(stat_shape,) * 4,
        grid=(nt,),
        in_specs=[row_spec, row_spec, _full((C, C2)), _full((C, C2))],
        out_specs=(stat_spec,) * 4,
        compiler_params=_COMPILER_PARAMS,
    )(g_bf, x_bf, wg.astype(jnp.bfloat16), wx.astype(jnp.bfloat16))

    # Tiny per-channel math in f32 (outside the kernels).  Conv biases (bg, bx)
    # cancel against the BN mean subtraction in training mode, so they do not
    # appear in the folded weights / shift.
    m_g = jnp.sum(sg, axis=(0, 1)) / T
    m_x = jnp.sum(sx, axis=(0, 1)) / T
    v_g = jnp.maximum(jnp.sum(qg, axis=(0, 1)) / T - m_g * m_g, 0.0)
    v_x = jnp.maximum(jnp.sum(qx, axis=(0, 1)) / T - m_x * m_x, 0.0)
    sc_g = gam_g * jax.lax.rsqrt(v_g + EPS)
    sc_x = gam_x * jax.lax.rsqrt(v_x + EPS)
    wg_eff = (wg * sc_g).astype(jnp.bfloat16)
    wx_eff = (wx * sc_x).astype(jnp.bfloat16)
    shift = (bet_g - m_g * sc_g + bet_x - m_x * sc_x).reshape(1, C2)
    wp_row = wp.reshape(1, C2).astype(jnp.float32)

    # ---- pass 2: fused BN1 + ReLU + psi 1x1 conv -> p (pre-BN psi logits) ----
    p = pl.pallas_call(
        _apply_kernel,
        out_shape=jax.ShapeDtypeStruct((T, 1), jnp.float32),
        grid=(nt,),
        in_specs=[row_spec, row_spec, _full((C, C2)), _full((C, C2)),
                  _full((1, C2)), _full((1, C2))],
        out_specs=pl.BlockSpec((tile, 1), lambda i: (i, 0)),
        compiler_params=_COMPILER_PARAMS,
    )(g_bf, x_bf, wg_eff, wx_eff, shift, wp_row)

    # psi BatchNorm (1 channel) statistics over all T tokens: p is a tiny (T, 1)
    # f32 array, so this reduction is a trivial XLA op.  bp cancels like bg/bx.
    m_p = jnp.mean(p)
    v_p = jnp.mean(jnp.square(p - m_p))
    s_p = gam_p * jax.lax.rsqrt(v_p + EPS)
    a = s_p.reshape(1, 1)
    c = (bet_p - m_p * s_p).reshape(1, 1)

    # ---- pass 3: gate x with sigmoid(BN(psi logits)) ----
    out = pl.pallas_call(
        _gate_kernel,
        out_shape=jax.ShapeDtypeStruct((T, C), x.dtype),
        grid=(nt,),
        in_specs=[row_spec, pl.BlockSpec((tile, 1), lambda i: (i, 0)),
                  _full((1, 1)), _full((1, 1))],
        out_specs=row_spec,
        compiler_params=_COMPILER_PARAMS,
    )(x_hp, p, a, c)

    return out.reshape(N, H, W, C)


# --------------------------- pure-JAX f32 reference ---------------------------

def attention_block_reference(g, x, params):
    """f32 reference mirroring the PyTorch AttentionBlock forward (training BN)."""
    (wg, bg, gam_g, bet_g,
     wx, bx, gam_x, bet_x,
     wp, bp, gam_p, bet_p) = params
    N, H, W, C = x.shape
    T = N * H * W
    g2 = g.reshape(T, C).astype(jnp.float32)
    x2 = x.reshape(T, C).astype(jnp.float32)

    def bn(y, gamma, beta):
        m = jnp.mean(y, axis=0, keepdims=True)
        v = jnp.mean((y - m) ** 2, axis=0, keepdims=True)
        return (y - m) * jax.lax.rsqrt(v + EPS) * gamma + beta

    g1 = bn(g2 @ wg + bg, gam_g, bet_g)
    x1 = bn(x2 @ wx + bx, gam_x, bet_x)
    h = jnp.maximum(g1 + x1, 0.0)
    p = h @ wp[:, None] + bp
    psi = jax.nn.sigmoid(bn(p, gam_p, bet_p))
    return (x2 * psi).astype(x.dtype).reshape(N, H, W, C)


# --------------------------- rest of Up (plain JAX / XLA) ---------------------
# TODO(synk): bilinear upsample, pad, concat and the 3x3 DoubleConv run as plain
# JAX/XLA ops (NHWC); only the attention gate is hand-written Pallas here.

def bilinear_upsample_x2(x):
    """NHWC bilinear upsample, scale_factor=2, align_corners=True."""
    N, H, W, C = x.shape
    Ho, Wo = 2 * H, 2 * W

    def coords(n_in, n_out):
        if n_in == 1:
            z = jnp.zeros((n_out,), jnp.int32)
            return jnp.zeros((n_out,), jnp.float32), z, z
        src = jnp.arange(n_out, dtype=jnp.float32) * (n_in - 1) / (n_out - 1)
        lo = jnp.clip(jnp.floor(src).astype(jnp.int32), 0, n_in - 2)
        return src - lo.astype(jnp.float32), lo, lo + 1

    fy, y0, y1 = coords(H, Ho)
    fx, x0, x1 = coords(W, Wo)
    fx = fx[None, None, :, None]
    fy = fy[None, :, None, None]
    top = x[:, y0]
    bot = x[:, y1]
    top = top[:, :, x0] * (1.0 - fx) + top[:, :, x1] * fx
    bot = bot[:, :, x0] * (1.0 - fx) + bot[:, :, x1] * fx
    return top * (1.0 - fy) + bot * fy


def pad_to_match(x1, x2):
    """F.pad(x1, [dX//2, dX-dX//2, dY//2, dY-dY//2]) in NHWC."""
    dY = x2.shape[1] - x1.shape[1]
    dX = x2.shape[2] - x1.shape[2]
    return jnp.pad(x1, ((0, 0), (dY // 2, dY - dY // 2),
                        (dX // 2, dX - dX // 2), (0, 0)))


def _bn_train_nhwc(y, gamma, beta):
    m = jnp.mean(y, axis=(0, 1, 2), keepdims=True)
    v = jnp.mean((y - m) ** 2, axis=(0, 1, 2), keepdims=True)
    return (y - m) * jax.lax.rsqrt(v + EPS) * gamma + beta


def double_conv(x, params):
    """DoubleConv: (3x3 conv -> BN -> ReLU) x 2, NHWC, training-mode BN."""
    w1, gam1, bet1, w2, gam2, bet2 = params
    dn = ("NHWC", "HWIO", "NHWC")
    h = jax.lax.conv_general_dilated(x, w1, (1, 1), "SAME", dimension_numbers=dn)
    h = jnp.maximum(_bn_train_nhwc(h, gam1, bet1), 0.0)
    h = jax.lax.conv_general_dilated(h, w2, (1, 1), "SAME", dimension_numbers=dn)
    return jnp.maximum(_bn_train_nhwc(h, gam2, bet2), 0.0)


def make_up_forward(attention_fn):
    """Up.forward (bilinear=True, attention=True), NHWC end-to-end.

    Keeping the whole block NHWC removes the NCHW<->NHWC transposes around the
    Pallas kernels (channels are already minor-most, so (N,H,W,C)->(T,C) is a
    free reshape)."""
    def forward(x1, x2, params):
        att_params, conv_params = params
        x1u = pad_to_match(bilinear_upsample_x2(x1), x2)
        x2g = attention_fn(x1u, x2, att_params)      # AttentionBlock(g=x1, x=x2)
        xc = jnp.concatenate([x2g, x1u], axis=-1)    # cat([x2, x1], channel dim)
        return double_conv(xc, conv_params)
    return forward


# --------------------------- parameters & demo --------------------------------

def make_params(key, in_channels, out_channels):
    """Deterministic synthetic params matching Up(in_ch, out_ch, bilinear=True,
    attention=True)."""
    catt = in_channels // 2      # AttentionBlock num_channels
    c2 = catt // 2
    mid = in_channels // 2       # DoubleConv mid_channels
    ks = jax.random.split(key, 12)

    att = (
        0.3 * jax.random.normal(ks[0], (catt, c2), jnp.float32),    # W_g weight
        0.1 * jax.random.normal(ks[1], (c2,), jnp.float32),         # W_g bias
        1.0 + 0.2 * jax.random.normal(ks[2], (c2,), jnp.float32),   # BN_g gamma
        0.1 * jax.random.normal(ks[3], (c2,), jnp.float32),         # BN_g beta
        0.3 * jax.random.normal(ks[4], (catt, c2), jnp.float32),    # W_x weight
        0.1 * jax.random.normal(ks[5], (c2,), jnp.float32),         # W_x bias
        jnp.full((c2,), 0.9, jnp.float32),                          # BN_x gamma
        jnp.full((c2,), -0.05, jnp.float32),                        # BN_x beta
        0.3 * jax.random.normal(ks[6], (c2,), jnp.float32),         # psi weight
        jnp.full((1,), 0.05, jnp.float32),                          # psi bias
        jnp.full((1,), 1.1, jnp.float32),                           # BN_psi gamma
        jnp.full((1,), 0.02, jnp.float32),                          # BN_psi beta
    )
    conv = (
        0.2 * jax.random.normal(ks[7], (3, 3, in_channels, mid), jnp.float32),
        1.0 + 0.1 * jax.random.normal(ks[8], (mid,), jnp.float32),
        0.05 * jax.random.normal(ks[9], (mid,), jnp.float32),
        0.2 * jax.random.normal(ks[10], (3, 3, mid, out_channels), jnp.float32),
        1.0 + 0.1 * jax.random.normal(ks[11], (out_channels,), jnp.float32),
        jnp.zeros((out_channels,), jnp.float32),
    )
    return att, conv


if __name__ == "__main__":
    key = jax.random.PRNGKey(0)
    k1, k2, kp = jax.random.split(key, 3)

    # Up(in_channels=16, out_channels=8, bilinear=True, attention=True), NHWC.
    N, IC, OC, H, W = 2, 16, 8, 16, 16
    CATT = IC // 2
    x1 = jax.random.normal(k1, (N, H // 2, W // 2, CATT), jnp.float32)  # deep feat
    x2 = jax.random.normal(k2, (N, H, W, CATT), jnp.float32)            # skip feat
    params = make_params(kp, IC, OC)

    pallas_attn = functools.partial(attention_block_nhwc, tile_t=128)   # 4 tiles
    up_pallas = jax.jit(make_up_forward(pallas_attn))
    up_ref_fn = jax.jit(make_up_forward(attention_block_reference))

    out = jax.block_until_ready(up_pallas(x1, x2, params))
    ref = jax.block_until_ready(up_ref_fn(x1, x2, params))

    # Direct check of the Pallas attention gate against the f32 reference.
    x1u = pad_to_match(bilinear_upsample_x2(x1), x2)
    att = jax.block_until_ready(pallas_attn(x1u, x2, params[0]))
    att_ref = attention_block_reference(x1u, x2, params[0])

    assert out.shape == (N, H, W, OC)
    assert att.shape == x2.shape
    # Tolerances account for bf16 MXU input streams (per perf feedback) vs the
    # f32 PyTorch-style reference.
    assert jnp.allclose(att, att_ref, atol=7.5e-2, rtol=5e-2), "attention gate mismatch"
    assert jnp.allclose(out, ref, atol=1e-1, rtol=5e-2), "Up forward mismatch"

    print("KERNEL_OK")
</pallas_src>

<mosaic_0001>
module attributes {stable_mosaic.version = 11 : i64} {
  func.func @_stats_kernel(%arg0: i32, %arg1: memref<128x8xbf16, #tpu.memory_space<vmem>>, %arg2: memref<128x8xbf16, #tpu.memory_space<vmem>>, %arg3: memref<8x4xbf16, #tpu.memory_space<vmem>>, %arg4: memref<8x4xbf16, #tpu.memory_space<vmem>>, %arg5: memref<1x1x4xf32, #tpu.memory_space<vmem>>, %arg6: memref<1x1x4xf32, #tpu.memory_space<vmem>>, %arg7: memref<1x1x4xf32, #tpu.memory_space<vmem>>, %arg8: memref<1x1x4xf32, #tpu.memory_space<vmem>>) attributes {dimension_semantics = [#tpu.dimension_semantics<parallel>], iteration_bounds = array<i64: 4>, scalar_prefetch = 0 : i64, scratch_operands = 0 : i64, tpu.core_type = #tpu.core_type<tc>, window_params = [{transform_indices = @transform_0, window_bounds = array<i64: 128, 8>}, {transform_indices = @transform_1, window_bounds = array<i64: 128, 8>}, {pipeline_mode = #tpu.pipeline_mode<synchronous>, transform_indices = @transform_2, window_bounds = array<i64: 8, 4>}, {pipeline_mode = #tpu.pipeline_mode<synchronous>, transform_indices = @transform_3, window_bounds = array<i64: 8, 4>}, {transform_indices = @transform_4, window_bounds = array<i64: 1, 1, 4>}, {transform_indices = @transform_5, window_bounds = array<i64: 1, 1, 4>}, {transform_indices = @transform_6, window_bounds = array<i64: 1, 1, 4>}, {transform_indices = @transform_7, window_bounds = array<i64: 1, 1, 4>}]} {
    %c0 = arith.constant 0 : index
    %c0_0 = arith.constant 0 : index
    %0 = vector.load %arg1[%c0, %c0_0] : memref<128x8xbf16, #tpu.memory_space<vmem>>, vector<128x8xbf16>
    %c0_1 = arith.constant 0 : index
    %c0_2 = arith.constant 0 : index
    %1 = vector.load %arg3[%c0_1, %c0_2] : memref<8x4xbf16, #tpu.memory_space<vmem>>, vector<8x4xbf16>
    %cst = arith.constant dense<0.000000e+00> : vector<128x4xf32>
    %2 = tpu.matmul %0, %1, %cst {dimension_numbers = #tpu.dot_dimension_numbers<[1], [0], [0], [1], [0, 0, 1, 1], [], []>} : vector<128x8xbf16>, vector<8x4xbf16>, vector<128x4xf32> -> vector<128x4xf32>
    %c0_3 = arith.constant 0 : index
    %c0_4 = arith.constant 0 : index
    %3 = vector.load %arg2[%c0_3, %c0_4] : memref<128x8xbf16, #tpu.memory_space<vmem>>, vector<128x8xbf16>
    %c0_5 = arith.constant 0 : index
    %c0_6 = arith.constant 0 : index
    %4 = vector.load %arg4[%c0_5, %c0_6] : memref<8x4xbf16, #tpu.memory_space<vmem>>, vector<8x4xbf16>
    %cst_7 = arith.constant dense<0.000000e+00> : vector<128x4xf32>
    %5 = tpu.matmul %3, %4, %cst_7 {dimension_numbers = #tpu.dot_dimension_numbers<[1], [0], [0], [1], [0, 0, 1, 1], [], []>} : vector<128x8xbf16>, vector<8x4xbf16>, vector<128x4xf32> -> vector<128x4xf32>
    %cst_8 = arith.constant dense<0.000000e+00> : vector<4xf32>
    %6 = vector.multi_reduction <add>, %2, %cst_8 [0] : vector<128x4xf32> to vector<4xf32>
    %7 = vector.shape_cast %6 : vector<4xf32> to vector<1x4xf32>
    %8 = vector.shape_cast %7 : vector<1x4xf32> to vector<1x1x4xf32>
    %c0_9 = arith.constant 0 : index
    %c0_10 = arith.constant 0 : index
    %c0_11 = arith.constant 0 : index
    %9 = vector.load %arg5[%c0_9, %c0_10, %c0_11] : memref<1x1x4xf32, #tpu.memory_space<vmem>>, vector<1x1x4xf32>
    tpu.vector_store %arg5[%c0_9, %c0_10, %c0_11], %8 {strides = array<i32>} : memref<1x1x4xf32, #tpu.memory_space<vmem>>, vector<1x1x4xf32>,
    %10 = arith.mulf %2, %2 : vector<128x4xf32>
    %cst_12 = arith.constant dense<0.000000e+00> : vector<4xf32>
    %11 = vector.multi_reduction <add>, %10, %cst_12 [0] : vector<128x4xf32> to vector<4xf32>
    %12 = vector.shape_cast %11 : vector<4xf32> to vector<1x4xf32>
    %13 = vector.shape_cast %12 : vector<1x4xf32> to vector<1x1x4xf32>
    %c0_13 = arith.constant 0 : index
    %c0_14 = arith.constant 0 : index
    %c0_15 = arith.constant 0 : index
    %14 = vector.load %arg6[%c0_13, %c0_14, %c0_15] : memref<1x1x4xf32, #tpu.memory_space<vmem>>, vector<1x1x4xf32>
    tpu.vector_store %arg6[%c0_13, %c0_14, %c0_15], %13 {strides = array<i32>} : memref<1x1x4xf32, #tpu.memory_space<vmem>>, vector<1x1x4xf32>,
    %cst_16 = arith.constant dense<0.000000e+00> : vector<4xf32>
    %15 = vector.multi_reduction <add>, %5, %cst_16 [0] : vector<128x4xf32> to vector<4xf32>
    %16 = vector.shape_cast %15 : vector<4xf32> to vector<1x4xf32>
    %17 = vector.shape_cast %16 : vector<1x4xf32> to vector<1x1x4xf32>
    %c0_17 = arith.constant 0 : index
    %c0_18 = arith.constant 0 : index
    %c0_19 = arith.constant 0 : index
    %18 = vector.load %arg7[%c0_17, %c0_18, %c0_19] : memref<1x1x4xf32, #tpu.memory_space<vmem>>, vector<1x1x4xf32>
    tpu.vector_store %arg7[%c0_17, %c0_18, %c0_19], %17 {strides = array<i32>} : memref<1x1x4xf32, #tpu.memory_space<vmem>>, vector<1x1x4xf32>,
    %19 = arith.mulf %5, %5 : vector<128x4xf32>
    %cst_20 = arith.constant dense<0.000000e+00> : vector<4xf32>
    %20 = vector.multi_reduction <add>, %19, %cst_20 [0] : vector<128x4xf32> to vector<4xf32>
    %21 = vector.shape_cast %20 : vector<4xf32> to vector<1x4xf32>
    %22 = vector.shape_cast %21 : vector<1x4xf32> to vector<1x1x4xf32>
    %c0_21 = arith.constant 0 : index
    %c0_22 = arith.constant 0 : index
    %c0_23 = arith.constant 0 : index
    %23 = vector.load %arg8[%c0_21, %c0_22, %c0_23] : memref<1x1x4xf32, #tpu.memory_space<vmem>>, vector<1x1x4xf32>
    tpu.vector_store %arg8[%c0_21, %c0_22, %c0_23], %22 {strides = array<i32>} : memref<1x1x4xf32, #tpu.memory_space<vmem>>, vector<1x1x4xf32>,
    return
  }
  func.func @transform_0(%arg0: i32) -> (i32, i32) {
    %c0_i32 = arith.constant 0 : i32
    %c0_i32_0 = arith.constant 0 : i32
    return %arg0, %c0_i32 : i32, i32
  }
  func.func @transform_1(%arg0: i32) -> (i32, i32) {
    %c0_i32 = arith.constant 0 : i32
    %c0_i32_0 = arith.constant 0 : i32
    return %arg0, %c0_i32 : i32, i32
  }
  func.func @transform_2(%arg0: i32) -> (i32, i32) {
    %c0_i32 = arith.constant 0 : i32
    %c0_i32_0 = arith.constant 0 : i32
    %c0_i32_1 = arith.constant 0 : i32
    return %c0_i32, %c0_i32_0 : i32, i32
  }
  func.func @transform_3(%arg0: i32) -> (i32, i32) {
    %c0_i32 = arith.constant 0 : i32
    %c0_i32_0 = arith.constant 0 : i32
    %c0_i32_1 = arith.constant 0 : i32
    return %c0_i32, %c0_i32_0 : i32, i32
  }
  func.func @transform_4(%arg0: i32) -> (i32, i32, i32) {
    %c0_i32 = arith.constant 0 : i32
    %c0_i32_0 = arith.constant 0 : i32
    %c0_i32_1 = arith.constant 0 : i32
    return %arg0, %c0_i32, %c0_i32_0 : i32, i32, i32
  }
  func.func @transform_5(%arg0: i32) -> (i32, i32, i32) {
    %c0_i32 = arith.constant 0 : i32
    %c0_i32_0 = arith.constant 0 : i32
    %c0_i32_1 = arith.constant 0 : i32
    return %arg0, %c0_i32, %c0_i32_0 : i32, i32, i32
  }
  func.func @transform_6(%arg0: i32) -> (i32, i32, i32) {
    %c0_i32 = arith.constant 0 : i32
    %c0_i32_0 = arith.constant 0 : i32
    %c0_i32_1 = arith.constant 0 : i32
    return %arg0, %c0_i32, %c0_i32_0 : i32, i32, i32
  }
  func.func @transform_7(%arg0: i32) -> (i32, i32, i32) {
    %c0_i32 = arith.constant 0 : i32
    %c0_i32_0 = arith.constant 0 : i32
    %c0_i32_1 = arith.constant 0 : i32
    return %arg0, %c0_i32, %c0_i32_0 : i32, i32, i32
  }
}

module attributes {stable_mosaic.version = 11 : i64} {
  func.func @_apply_kernel(%arg0: i32, %arg1: memref<128x8xbf16, #tpu.memory_space<vmem>>, %arg2: memref<128x8xbf16, #tpu.memory_space<vmem>>, %arg3: memref<8x4xbf16, #tpu.memory_space<vmem>>, %arg4: memref<8x4xbf16, #tpu.memory_space<vmem>>, %arg5: memref<1x4xf32, #tpu.memory_space<vmem>>, %arg6: memref<1x4xf32, #tpu.memory_space<vmem>>, %arg7: memref<128x1xf32, #tpu.memory_space<vmem>>) attributes {dimension_semantics = [#tpu.dimension_semantics<parallel>], iteration_bounds = array<i64: 4>, scalar_prefetch = 0 : i64, scratch_operands = 0 : i64, tpu.core_type = #tpu.core_type<tc>, window_params = [{transform_indices = @transform_0, window_bounds = array<i64: 128, 8>}, {transform_indices = @transform_1, window_bounds = array<i64: 128, 8>}, {pipeline_mode = #tpu.pipeline_mode<synchronous>, transform_indices = @transform_2, window_bounds = array<i64: 8, 4>}, {pipeline_mode = #tpu.pipeline_mode<synchronous>, transform_indices = @transform_3, window_bounds = array<i64: 8, 4>}, {pipeline_mode = #tpu.pipeline_mode<synchronous>, transform_indices = @transform_4, window_bounds = array<i64: 1, 4>}, {pipeline_mode = #tpu.pipeline_mode<synchronous>, transform_indices = @transform_5, window_bounds = array<i64: 1, 4>}, {transform_indices = @transform_6, window_bounds = array<i64: 128, 1>}]} {
    %c0 = arith.constant 0 : index
    %c0_0 = arith.constant 0 : index
    %0 = vector.load %arg1[%c0, %c0_0] : memref<128x8xbf16, #tpu.memory_space<vmem>>, vector<128x8xbf16>
    %c0_1 = arith.constant 0 : index
    %c0_2 = arith.constant 0 : index
    %1 = vector.load %arg3[%c0_1, %c0_2] : memref<8x4xbf16, #tpu.memory_space<vmem>>, vector<8x4xbf16>
    %cst = arith.constant dense<0.000000e+00> : vector<128x4xf32>
    %2 = tpu.matmul %0, %1, %cst {dimension_numbers = #tpu.dot_dimension_numbers<[1], [0], [0], [1], [0, 0, 1, 1], [], []>} : vector<128x8xbf16>, vector<8x4xbf16>, vector<128x4xf32> -> vector<128x4xf32>
    %c0_3 = arith.constant 0 : index
    %c0_4 = arith.constant 0 : index
    %3 = vector.load %arg2[%c0_3, %c0_4] : memref<128x8xbf16, #tpu.memory_space<vmem>>, vector<128x8xbf16>
    %c0_5 = arith.constant 0 : index
    %c0_6 = arith.constant 0 : index
    %4 = vector.load %arg4[%c0_5, %c0_6] : memref<8x4xbf16, #tpu.memory_space<vmem>>, vector<8x4xbf16>
    %cst_7 = arith.constant dense<0.000000e+00> : vector<128x4xf32>
    %5 = tpu.matmul %3, %4, %cst_7 {dimension_numbers = #tpu.dot_dimension_numbers<[1], [0], [0], [1], [0, 0, 1, 1], [], []>} : vector<128x8xbf16>, vector<8x4xbf16>, vector<128x4xf32> -> vector<128x4xf32>
    %6 = arith.addf %2, %5 : vector<128x4xf32>
    %c0_8 = arith.constant 0 : index
    %c0_9 = arith.constant 0 : index
    %7 = vector.load %arg5[%c0_8, %c0_9] : memref<1x4xf32, #tpu.memory_space<vmem>>, vector<1x4xf32>
    %8 = vector.broadcast %7 : vector<1x4xf32> to vector<128x4xf32>
    %9 = arith.addf %6, %8 : vector<128x4xf32>
    %cst_10 = arith.constant 0.000000e+00 : f32
    %10 = vector.broadcast %cst_10 : f32 to vector<128x4xf32>
    %11 = arith.maximumf %9, %10 : vector<128x4xf32>
    %c0_11 = arith.constant 0 : index
    %c0_12 = arith.constant 0 : index
    %12 = vector.load %arg6[%c0_11, %c0_12] : memref<1x4xf32, #tpu.memory_space<vmem>>, vector<1x4xf32>
    %13 = vector.broadcast %12 : vector<1x4xf32> to vector<128x4xf32>
    %14 = arith.mulf %11, %13 : vector<128x4xf32>
    %cst_13 = arith.constant dense<0.000000e+00> : vector<128xf32>
    %15 = vector.multi_reduction <add>, %14, %cst_13 [1] : vector<128x4xf32> to vector<128xf32>
    %16 = vector.shape_cast %15 : vector<128xf32> to vector<128x1xf32>
    %c0_14 = arith.constant 0 : index
    %c0_15 = arith.constant 0 : index
    %17 = vector.load %arg7[%c0_14, %c0_15] : memref<128x1xf32, #tpu.memory_space<vmem>>, vector<128x1xf32>
    tpu.vector_store %arg7[%c0_14, %c0_15], %16 {strides = array<i32>} : memref<128x1xf32, #tpu.memory_space<vmem>>, vector<128x1xf32>,
    return
  }
  func.func @transform_0(%arg0: i32) -> (i32, i32) {
    %c0_i32 = arith.constant 0 : i32
    %c0_i32_0 = arith.constant 0 : i32
    return %arg0, %c0_i32 : i32, i32
  }
  func.func @transform_1(%arg0: i32) -> (i32, i32) {
    %c0_i32 = arith.constant 0 : i32
    %c0_i32_0 = arith.constant 0 : i32
    return %arg0, %c0_i32 : i32, i32
  }
  func.func @transform_2(%arg0: i32) -> (i32, i32) {
    %c0_i32 = arith.constant 0 : i32
    %c0_i32_0 = arith.constant 0 : i32
    %c0_i32_1 = arith.constant 0 : i32
    return %c0_i32, %c0_i32_0 : i32, i32
  }
  func.func @transform_3(%arg0: i32) -> (i32, i32) {
    %c0_i32 = arith.constant 0 : i32
    %c0_i32_0 = arith.constant 0 : i32
    %c0_i32_1 = arith.constant 0 : i32
    return %c0_i32, %c0_i32_0 : i32, i32
  }
  func.func @transform_4(%arg0: i32) -> (i32, i32) {
    %c0_i32 = arith.constant 0 : i32
    %c0_i32_0 = arith.constant 0 : i32
    %c0_i32_1 = arith.constant 0 : i32
    return %c0_i32, %c0_i32_0 : i32, i32
  }
  func.func @transform_5(%arg0: i32) -> (i32, i32) {
    %c0_i32 = arith.constant 0 : i32
    %c0_i32_0 = arith.constant 0 : i32
    %c0_i32_1 = arith.constant 0 : i32
    return %c0_i32, %c0_i32_0 : i32, i32
  }
  func.func @transform_6(%arg0: i32) -> (i32, i32) {
    %c0_i32 = arith.constant 0 : i32
    %c0_i32_0 = arith.constant 0 : i32
    return %arg0, %c0_i32 : i32, i32
  }
}

module attributes {stable_mosaic.version = 11 : i64} {
  func.func @_gate_kernel(%arg0: i32, %arg1: memref<128x8xf32, #tpu.memory_space<vmem>>, %arg2: memref<128x1xf32, #tpu.memory_space<vmem>>, %arg3: memref<1x1xf32, #tpu.memory_space<vmem>>, %arg4: memref<1x1xf32, #tpu.memory_space<vmem>>, %arg5: memref<128x8xf32, #tpu.memory_space<vmem>>) attributes {dimension_semantics = [#tpu.dimension_semantics<parallel>], iteration_bounds = array<i64: 4>, scalar_prefetch = 0 : i64, scratch_operands = 0 : i64, tpu.core_type = #tpu.core_type<tc>, window_params = [{transform_indices = @transform_0, window_bounds = array<i64: 128, 8>}, {transform_indices = @transform_1, window_bounds = array<i64: 128, 1>}, {pipeline_mode = #tpu.pipeline_mode<synchronous>, transform_indices = @transform_2, window_bounds = array<i64: 1, 1>}, {pipeline_mode = #tpu.pipeline_mode<synchronous>, transform_indices = @transform_3, window_bounds = array<i64: 1, 1>}, {transform_indices = @transform_4, window_bounds = array<i64: 128, 8>}]} {
    %c0 = arith.constant 0 : index
    %c0_0 = arith.constant 0 : index
    %0 = vector.load %arg2[%c0, %c0_0] : memref<128x1xf32, #tpu.memory_space<vmem>>, vector<128x1xf32>
    %c0_1 = arith.constant 0 : index
    %c0_2 = arith.constant 0 : index
    %1 = vector.load %arg3[%c0_1, %c0_2] : memref<1x1xf32, #tpu.memory_space<vmem>>, vector<1x1xf32>
    %2 = vector.extract %1[0, 0] : f32 from vector<1x1xf32>
    %3 = vector.broadcast %2 : f32 to vector<128x1xf32>
    %4 = arith.mulf %0, %3 : vector<128x1xf32>
    %c0_3 = arith.constant 0 : index
    %c0_4 = arith.constant 0 : index
    %5 = vector.load %arg4[%c0_3, %c0_4] : memref<1x1xf32, #tpu.memory_space<vmem>>, vector<1x1xf32>
    %6 = vector.extract %5[0, 0] : f32 from vector<1x1xf32>
    %7 = vector.broadcast %6 : f32 to vector<128x1xf32>
    %8 = arith.addf %4, %7 : vector<128x1xf32>
    %9 = arith.negf %8 : vector<128x1xf32>
    %10 = math.exp %9 : vector<128x1xf32>
    %cst = arith.constant 1.000000e+00 : f32
    %11 = vector.broadcast %cst : f32 to vector<128x1xf32>
    %12 = arith.addf %11, %10 : vector<128x1xf32>
    %13 = arith.divf %11, %12 : vector<128x1xf32>
    %c0_5 = arith.constant 0 : index
    %c0_6 = arith.constant 0 : index
    %14 = vector.load %arg1[%c0_5, %c0_6] : memref<128x8xf32, #tpu.memory_space<vmem>>, vector<128x8xf32>
    %15 = vector.broadcast %13 : vector<128x1xf32> to vector<128x8xf32>
    %16 = arith.mulf %14, %15 : vector<128x8xf32>
    %c0_7 = arith.constant 0 : index
    %c0_8 = arith.constant 0 : index
    %17 = vector.load %arg5[%c0_7, %c0_8] : memref<128x8xf32, #tpu.memory_space<vmem>>, vector<128x8xf32>
    tpu.vector_store %arg5[%c0_7, %c0_8], %16 {strides = array<i32>} : memref<128x8xf32, #tpu.memory_space<vmem>>, vector<128x8xf32>,
    return
  }
  func.func @transform_0(%arg0: i32) -> (i32, i32) {
    %c0_i32 = arith.constant 0 : i32
    %c0_i32_0 = arith.constant 0 : i32
    return %arg0, %c0_i32 : i32, i32
  }
  func.func @transform_1(%arg0: i32) -> (i32, i32) {
    %c0_i32 = arith.constant 0 : i32
    %c0_i32_0 = arith.constant 0 : i32
    return %arg0, %c0_i32 : i32, i32
  }
  func.func @transform_2(%arg0: i32) -> (i32, i32) {
    %c0_i32 = arith.constant 0 : i32
    %c0_i32_0 = arith.constant 0 : i32
    %c0_i32_1 = arith.constant 0 : i32
    return %c0_i32, %c0_i32_0 : i32, i32
  }
  func.func @transform_3(%arg0: i32) -> (i32, i32) {
    %c0_i32 = arith.constant 0 : i32
    %c0_i32_0 = arith.constant 0 : i32
    %c0_i32_1 = arith.constant 0 : i32
    return %c0_i32, %c0_i32_0 : i32, i32
  }
  func.func @transform_4(%arg0: i32) -> (i32, i32) {
    %c0_i32 = arith.constant 0 : i32
    %c0_i32_0 = arith.constant 0 : i32
    return %arg0, %c0_i32 : i32, i32
  }
}

</mosaic_0001>

<bundles_post_ra>
// kernel: forward.4
= control target key start
LH: loop header
LB: loop body
LE: loop exit
PB: predicated region body
PF: predicated region fallthrough
CT: control target
= control target key end

     0   :  { %s900_s21 = smov 0   ;;  %s1038_s0 = inlined_call_operand.vmem [shape: bf16[512,8], index: 0, kind: input, shape index: {}]   ;;  %s1039_s1 = inlined_call_operand.vmem [shape: bf16[512,8], index: 1, kind: input, shape index: {}]   ;;  %s1040_s2 = inlined_call_operand.vmem [shape: bf16[8,4], index: 2, kind: input, shape index: {}]   ;;  %s1041_s3 = inlined_call_operand.vmem [shape: bf16[8,4], index: 3, kind: input, shape index: {}]   ;;  %s1042_s4 = inlined_call_operand.vmem [shape: f32[1,4], index: 4, kind: input, shape index: {}]   ;;  %s1043_s5 = inlined_call_operand.vmem [shape: f32[1,4], index: 5, kind: input, shape index: {}]   ;;  %s1044_s6 = inlined_call_operand.vmem [shape: f32[512,1], index: 6, kind: output, shape index: {}]  }
   0x1 LB: > { %s736_s22 = sadd.s32 4294967295, %s863_s21   ;;  %p740_p0 = scmp.ge.s32.totalorder %s863_s21, 1  ;;  %s863_s21 = sphi %s900_s21, %s16_s21  }
   0x2   : > { %p224_p1 = scmp.lt.s32.totalorder %s863_s21, 5 }
   0x4   : > { %p225_p2 = pnand %p740_p0, %p224_p1 }
   0x5   : > { %s741_s27 = sshll.u32 (!%p225_p2), %s736_s22, 4 }
   0x6   : > { %228 = sbr.rel (%p225_p2) target bundleno = 333 (0x14d), region = 44  ;;  %p260_p3 = scmp.lt.s32.totalorder (!%p225_p2), %s741_s27, 63 }
   0xb   : > { %v311_v0 = vld [vmem:[%s1041_s3] sm:$0xf]  ;;  %vm377_vm0 = vcmask 1043456   ;;  %s1046_s27 = smov (!%p260_p3, %s741_s27), 63  ;;  %vm352_vm1 = vcmask 64512   ;;  %vm602_vm2 = vcmask 31744  }
   0xc   : > { %v294_v1 = vld [vmem:[%s1040_s2] sm:$0xf]  ;;  %v379_v2 = vsel %vm377_vm0, %v311_v0, 0  ;;  %s742_s28 = sshll.u32 %s1046_s27, 2  ;;  %s746_s15 = sshll.u32 %s1046_s27, 3  ;;  %vm651_vm3 = vcmask 7168  }
   0xd   : > { %v495_v3 = vsel %vm377_vm0, %v294_v1, 0  ;;  %388 = vmatpush.bf16.msra.mxu0 %v379_v2  ;;  %845 = vmatpush.bf16.msra.mxu2 %v379_v2  ;;  %s269_s7 = scalar_lea.vmem %s1039_s1, %s742_s28  ;;  %s263_s10 = scalar_lea.vmem %s1038_s0, %s742_s28  ;;  %v942_v21 = vld [vmem:[%s1042_s4] ss:$0 sm:$0xff] }
   0xe   : > { %504 = vmatpush.bf16.msra.mxu1 %v495_v3  ;;  %846 = vmatpush.bf16.msra.mxu3 %v495_v3  ;;  %v837_v4 = vld [vmem:[%s269_s7] sm:$0xff]  ;;  %v838_v8 = vld [vmem:[%s269_s7 + $0x8] sm:$0xff]  ;;  %v839_v12 = vld [vmem:[%s269_s7 + $0x10] sm:$0xff]  ;;  %s1001_s18 = scalar_lea.vmem %s1044_s6, %s746_s15 }
   0xf   : > { %v841_v5 = vld [vmem:[%s269_s7 + $0x20] sm:$0xff]  ;;  %v842_v9 = vld [vmem:[%s269_s7 + $0x28] sm:$0xff]  ;;  %v843_v13 = vld [vmem:[%s269_s7 + $0x30] sm:$0xff] }
  0x10   : > { %v829_v6 = vld [vmem:[%s263_s10] sm:$0xff]  ;;  %779 = vmatmul.msk.bf16.vlgmr.msra.gmra.mxu0 %vm352_vm1, %v837_v4  ;;  %783 = vmatmul.msk.bf16.vlgmr.msra.gmra.mxu2 %vm352_vm1, %v841_v5  ;;  %v830_v10 = vld [vmem:[%s263_s10 + $0x8] sm:$0xff]  ;;  %v831_v14 = vld [vmem:[%s263_s10 + $0x10] sm:$0xff] }
  0x11   : > { %v833_v7 = vld [vmem:[%s263_s10 + $0x20] sm:$0xff]  ;;  %819 = vmatmul.msk.bf16.vlgmr.msra.gmra.mxu1 %vm352_vm1, %v829_v6  ;;  %v834_v11 = vld [vmem:[%s263_s10 + $0x28] sm:$0xff]  ;;  %v835_v15 = vld [vmem:[%s263_s10 + $0x30] sm:$0xff] }
  0x12   : > { %823 = vmatmul.msk.bf16.vlgmr.msra.gmra.mxu3 %vm352_vm1, %v833_v7  ;;  %v840_v16 = vld [vmem:[%s269_s7 + $0x18] sm:$0xff]  ;;  %v948_v25 = vld [vmem:[%s1043_s5] ss:$0 sm:$0xff] }
  0x13   : > { %v844_v17 = vld [vmem:[%s269_s7 + $0x38] sm:$0xff] }
  0x14   : > { %v832_v18 = vld [vmem:[%s263_s10 + $0x18] sm:$0xff] }
  0x15   : > { %v836_v19 = vld [vmem:[%s263_s10 + $0x38] sm:$0xff] }
  0x20   : > { %780 = vmatmul.msk.bf16.gmra.mxu0 %vm352_vm1, %v838_v8  ;;  %784 = vmatmul.msk.bf16.gmra.mxu2 %vm352_vm1, %v842_v9 }
  0x21   : > { %820 = vmatmul.msk.bf16.gmra.mxu1 %vm352_vm1, %v830_v10 }
  0x22   : > { %824 = vmatmul.msk.bf16.gmra.mxu3 %vm352_vm1, %v834_v11 }
  0x30   : > { %781 = vmatmul.msk.bf16.gmra.mxu0 %vm352_vm1, %v839_v12  ;;  %785 = vmatmul.msk.bf16.gmra.mxu2 %vm352_vm1, %v843_v13 }
  0x31   : > { %821 = vmatmul.msk.bf16.gmra.mxu1 %vm352_vm1, %v831_v14 }
  0x32   : > { %825 = vmatmul.msk.bf16.gmra.mxu3 %vm352_vm1, %v835_v15 }
  0x40   : > { %782 = vmatmul.msk.bf16.gmra.mxu0 %vm352_vm1, %v840_v16  ;;  %786 = vmatmul.msk.bf16.gmra.mxu2 %vm352_vm1, %v844_v17 }
  0x41   : > { %822 = vmatmul.msk.bf16.gmra.mxu1 %vm352_vm1, %v832_v18 }
  0x42   : > { %826 = vmatmul.msk.bf16.gmra.mxu3 %vm352_vm1, %v836_v19 }
  0x8d   : > { %v390_v20 = vpop.f32.mrf.mxu0 }
  0x8e   : > { %v506_v22 = vpop.f32.mrf.mxu1 }
  0x8f   : > { %v507_v23 = vadd.f32 %v506_v22, %v390_v20 }
  0x91   : > { %v550_v24 = vadd.f32 %v942_v21, %v507_v23 }
  0x93   : > { %v566_v26 = vmax.f32 %v550_v24, 0.0  ;;  %v410_v27 = vpop.f32.mrf.mxu2 }
  0x95   : > { %v526_v28 = vpop.f32.mrf.mxu3  ;;  %v392_v30 = vpop.f32.mrf.mxu0  ;;  %v586_v31 = vmul.f32 %v948_v25, %v566_v26 }
  0x96   : > { %v527_v29 = vadd.f32 %v526_v28, %v410_v27  ;;  %v508_v32 = vpop.f32.mrf.mxu1 }
  0x97   : > { %v509_v34 = vadd.f32 %v508_v32, %v392_v30  ;;  %v603_v35 = vsel %vm602_vm2, %v586_v31, 0.0 }
  0x98   : > { %v558_v33 = vadd.f32 %v942_v21, %v527_v29  ;;  %604 = vadd.xlane.f32.xlu0 %v603_v35 }
  0x99   : > { %v551_v37 = vadd.f32 %v942_v21, %v509_v34 }
  0x9a   : > { %v574_v36 = vmax.f32 %v558_v33, 0.0 }
  0x9b   : > { %v567_v38 = vmax.f32 %v551_v37, 0.0  ;;  %v412_v39 = vpop.f32.mrf.mxu2 }
  0x9c   : > { %v594_v40 = vmul.f32 %v948_v25, %v574_v36 }
  0x9d   : > { %v528_v41 = vpop.f32.mrf.mxu3  ;;  %v395_v43 = vpop.f32.mrf.mxu0  ;;  %v587_v45 = vmul.f32 %v948_v25, %v567_v38 }
  0x9e   : > { %v529_v42 = vadd.f32 %v528_v41, %v412_v39  ;;  %v627_v44 = vsel %vm602_vm2, %v594_v40, 0.0  ;;  %v511_v46 = vpop.f32.mrf.mxu1 }
  0x9f   : > { %628 = vadd.xlane.f32.xlu2 %v627_v44  ;;  %v512_v48 = vadd.f32 %v511_v46, %v395_v43  ;;  %v606_v49 = vsel %vm602_vm2, %v587_v45, 0.0 }
  0xa0   : > { %v559_v47 = vadd.f32 %v942_v21, %v529_v42  ;;  %607 = vadd.xlane.f32.xlu0 %v606_v49 }
  0xa1   : > { %v552_v51 = vadd.f32 %v942_v21, %v512_v48 }
  0xa2   : > { %v575_v50 = vmax.f32 %v559_v47, 0.0 }
  0xa3   : > { %v568_v52 = vmax.f32 %v552_v51, 0.0  ;;  %v415_v53 = vpop.f32.mrf.mxu2 }
  0xa4   : > { %v595_v54 = vmul.f32 %v948_v25, %v575_v50 }
  0xa5   : > { %v531_v55 = vpop.f32.mrf.mxu3  ;;  %v397_v57 = vpop.f32.mrf.mxu0  ;;  %v588_v58 = vmul.f32 %v948_v25, %v568_v52 }
  0xa6   : > { %v532_v56 = vadd.f32 %v531_v55, %v415_v53  ;;  %v513_v59 = vpop.f32.mrf.mxu1  ;;  %v630_v63 = vsel %vm602_vm2, %v595_v54, 0.0 }
  0xa7   : > { %v514_v61 = vadd.f32 %v513_v59, %v397_v57  ;;  %v609_v62 = vsel %vm602_vm2, %v588_v58, 0.0 }
  0xa8   : > { %v560_v60 = vadd.f32 %v942_v21, %v532_v56  ;;  %610 = vadd.xlane.f32.xlu1 %v609_v62  ;;  %631 = vadd.xlane.f32.xlu0 %v630_v63 }
  0xa9   : > { %v553_v1 = vadd.f32 %v942_v21, %v514_v61 }
  0xaa   : > { %v576_v0 = vmax.f32 %v560_v60, 0.0 }
  0xab   : > { %v417_v2 = vpop.f32.mrf.mxu2  ;;  %v569_v9 = vmax.f32 %v553_v1, 0.0 }
  0xac   : > { %v596_v3 = vmul.f32 %v948_v25, %v576_v0 }
  0xad   : > { %v533_v4 = vpop.f32.mrf.mxu3  ;;  %v400_v6 = vpop.f32.mrf.mxu0  ;;  %v589_v16 = vmul.f32 %v948_v25, %v569_v9 }
  0xae   : > { %v534_v5 = vadd.f32 %v533_v4, %v417_v2  ;;  %v633_v7 = vsel %vm602_vm2, %v596_v3, 0.0  ;;  %v516_v8 = vpop.f32.mrf.mxu1 }
  0xaf   : > { %v517_v11 = vadd.f32 %v516_v8, %v400_v6  ;;  %v612_v27 = vsel %vm602_vm2, %v589_v16, 0.0 }
  0xb0   : > { %v561_v10 = vadd.f32 %v942_v21, %v534_v5  ;;  %634 = vadd.xlane.f32.xlu1 %v633_v7 }
  0xb1   : > { %v554_v13 = vadd.f32 %v942_v21, %v517_v11 }
  0xb2   : > { %v577_v12 = vmax.f32 %v561_v10, 0.0 }
  0xb3   : > { %v420_v14 = vpop.f32.mrf.mxu2  ;;  %v570_v18 = vmax.f32 %v554_v13, 0.0 }
  0xb4   : > { %v597_v15 = vmul.f32 %v948_v25, %v577_v12 }
  0xb5   : > { %v536_v17 = vpop.f32.mrf.mxu3  ;;  %v402_v20 = vpop.f32.mrf.mxu0  ;;  %v590_v30 = vmul.f32 %v948_v25, %v570_v18 }
  0xb6   : > { %v537_v19 = vadd.f32 %v536_v17, %v420_v14  ;;  %v636_v22 = vsel %vm602_vm2, %v597_v15, 0.0  ;;  %v518_v23 = vpop.f32.mrf.mxu1 }
  0xb7   : > { %637 = vadd.xlane.f32.xlu2 %v636_v22  ;;  %v519_v26 = vadd.f32 %v518_v23, %v402_v20  ;;  %v615_v37 = vsel %vm602_vm2, %v590_v30, 0.0 }
  0xb8   : > { %v562_v24 = vadd.f32 %v942_v21, %v537_v19  ;;  %613 = vadd.xlane.f32.xlu1 %v612_v27 }
  0xb9   : > { %v555_v29 = vadd.f32 %v942_v21, %v519_v26 }
  0xba   : > { %v578_v28 = vmax.f32 %v562_v24, 0.0 }
  0xbb   : > { %v422_v31 = vpop.f32.mrf.mxu2  ;;  %v571_v34 = vmax.f32 %v555_v29, 0.0 }
  0xbc   : > { %v598_v32 = vmul.f32 %v948_v25, %v578_v28 }
  0xbd   : > { %v538_v33 = vpop.f32.mrf.mxu3  ;;  %v405_v36 = vpop.f32.mrf.mxu0  ;;  %v591_v44 = vmul.f32 %v948_v25, %v571_v34 }
  0xbe   : > { %v539_v35 = vadd.f32 %v538_v33, %v422_v31  ;;  %v639_v38 = vsel %vm602_vm2, %v598_v32, 0.0  ;;  %v521_v39 = vpop.f32.mrf.mxu1 }
  0xbf   : > { %616 = vadd.xlane.f32.xlu2 %v615_v37  ;;  %640 = vadd.xlane.f32.xlu0 %v639_v38  ;;  %v522_v41 = vadd.f32 %v521_v39, %v405_v36  ;;  %v618_v51 = vsel %vm602_vm2, %v591_v44, 0.0 }
  0xc0   : > { %v563_v40 = vadd.f32 %v942_v21, %v539_v35 }
  0xc1   : > { %v556_v43 = vadd.f32 %v942_v21, %v522_v41 }
  0xc2   : > { %v579_v42 = vmax.f32 %v563_v40, 0.0 }
  0xc3   : > { %v572_v45 = vmax.f32 %v556_v43, 0.0  ;;  %v425_v46 = vpop.f32.mrf.mxu2 }
  0xc4   : > { %v599_v47 = vmul.f32 %v948_v25, %v579_v42 }
  0xc5   : > { %v541_v48 = vpop.f32.mrf.mxu3  ;;  %v407_v50 = vpop.f32.mrf.mxu0  ;;  %v592_v52 = vmul.f32 %v948_v25, %v572_v45 }
  0xc6   : > { %v542_v49 = vadd.f32 %v541_v48, %v425_v46  ;;  %v642_v53 = vsel %vm602_vm2, %v599_v47, 0.0  ;;  %v523_v54 = vpop.f32.mrf.mxu1 }
  0xc7   : > { %619 = vadd.xlane.f32.xlu2 %v618_v51  ;;  %v524_v56 = vadd.f32 %v523_v54, %v407_v50  ;;  %v621_v57 = vsel %vm602_vm2, %v592_v52, 0.0 }
  0xc8   : > { %v564_v55 = vadd.f32 %v942_v21, %v542_v49  ;;  %622 = vadd.xlane.f32.xlu0 %v621_v57 }
  0xc9   : > { %v557_v59 = vadd.f32 %v942_v21, %v524_v56 }
  0xca   : > { %v580_v58 = vmax.f32 %v564_v55, 0.0 }
  0xcb   : > { %v573_v60 = vmax.f32 %v557_v59, 0.0  ;;  %v427_v61 = vpop.f32.mrf.mxu2 }
  0xcc   : > { %v600_v62 = vmul.f32 %v948_v25, %v580_v58 }
  0xcd   : > { %v543_v63 = vpop.f32.mrf.mxu3  ;;  %v593_v2 = vmul.f32 %v948_v25, %v573_v60 }
  0xce   : > { %v544_v0 = vadd.f32 %v543_v63, %v427_v61  ;;  %v645_v1 = vsel %vm602_vm2, %v600_v62, 0.0 }
  0xcf   : > { %646 = vadd.xlane.f32.xlu2 %v645_v1  ;;  %v624_v4 = vsel %vm602_vm2, %v593_v2, 0.0 }
  0xd0   : > { %v565_v3 = vadd.f32 %v942_v21, %v544_v0  ;;  %625 = vadd.xlane.f32.xlu1 %v624_v4 }
  0xd2   : > { %v581_v5 = vmax.f32 %v565_v3, 0.0 }
  0xd4   : > { %v601_v6 = vmul.f32 %v948_v25, %v581_v5 }
  0xd6   : > { %v648_v7 = vsel %vm602_vm2, %v601_v6, 0.0 }
  0xd7   : > { %649 = vadd.xlane.f32.xlu0 %v648_v7 }
  0xd8   : > { %643 = vadd.xlane.f32.xlu1 %v642_v53 }
 0x10b   : > { %v605_v21 = vpop.xlane.xlu0 %604 }
 0x10c   : > { %652 = vst.msk [vmem:[%s1001_s18] sm:$0xff] %vm651_vm3, %v605_v21 }
 0x112   : > { %v629_v25 = vpop.xlane.xlu2 %628 }
 0x113   : > { %660 = vst.msk [vmem:[%s1001_s18 + $0x40] sm:$0xff] %vm651_vm3, %v629_v25  ;;  %v608_v8 = vpop.xlane.xlu0 %607 }
 0x114   : > { %653 = vst.msk [vmem:[%s1001_s18 + $0x8] sm:$0xff] %vm651_vm3, %v608_v8 }
 0x11b   : > { %v611_v9 = vpop.xlane.xlu1 %610  ;;  %v632_v10 = vpop.xlane.xlu0 %631 }
 0x11c   : > { %654 = vst.msk [vmem:[%s1001_s18 + $0x10] sm:$0xff] %vm651_vm3, %v611_v9 }
 0x11d   : > { %661 = vst.msk [vmem:[%s1001_s18 + $0x48] sm:$0xff] %vm651_vm3, %v632_v10 }
 0x123   : > { %v635_v11 = vpop.xlane.xlu1 %634 }
 0x124   : > { %662 = vst.msk [vmem:[%s1001_s18 + $0x50] sm:$0xff] %vm651_vm3, %v635_v11 }
 0x12a   : > { %v638_v12 = vpop.xlane.xlu2 %637 }
 0x12b   : > { %663 = vst.msk [vmem:[%s1001_s18 + $0x58] sm:$0xff] %vm651_vm3, %v638_v12  ;;  %v614_v13 = vpop.xlane.xlu1 %613 }
 0x12c   : > { %655 = vst.msk [vmem:[%s1001_s18 + $0x18] sm:$0xff] %vm651_vm3, %v614_v13 }
 0x132   : > { %v617_v14 = vpop.xlane.xlu2 %616  ;;  %v641_v15 = vpop.xlane.xlu0 %640 }
 0x133   : > { %656 = vst.msk [vmem:[%s1001_s18 + $0x20] sm:$0xff] %vm651_vm3, %v617_v14 }
 0x134   : > { %664 = vst.msk [vmem:[%s1001_s18 + $0x60] sm:$0xff] %vm651_vm3, %v641_v15 }
 0x13a   : > { %v620_v16 = vpop.xlane.xlu2 %619 }
 0x13b   : > { %657 = vst.msk [vmem:[%s1001_s18 + $0x28] sm:$0xff] %vm651_vm3, %v620_v16  ;;  %v623_v17 = vpop.xlane.xlu0 %622 }
 0x13c   : > { %658 = vst.msk [vmem:[%s1001_s18 + $0x30] sm:$0xff] %vm651_vm3, %v623_v17 }
 0x142   : > { %v647_v18 = vpop.xlane.xlu2 %646 }
 0x143   : > { %666 = vst.msk [vmem:[%s1001_s18 + $0x70] sm:$0xff] %vm651_vm3, %v647_v18  ;;  %v626_v19 = vpop.xlane.xlu1 %625 }
 0x144   : > { %659 = vst.msk [vmem:[%s1001_s18 + $0x38] sm:$0xff] %vm651_vm3, %v626_v19 }
 0x14a   : > { %v650_v20 = vpop.xlane.xlu0 %649 }
 0x14b   : > { %667 = vst.msk [vmem:[%s1001_s18 + $0x78] sm:$0xff] %vm651_vm3, %v650_v20  ;;  %v644_v22 = vpop.xlane.xlu1 %643 }
 0x14c   : > { %665 = vst.msk [vmem:[%s1001_s18 + $0x68] sm:$0xff] %vm651_vm3, %v644_v22 }
 0x14d PF: > { %s16_s21 = sadd.s32 1, %s863_s21  }
 0x14e   : > { %p13_p4 = scmp.ge.s32.totalorder %s16_s21, 6  }
 0x150   :  { %15 = sbr.rel (!%p13_p4) target bundleno = 1 (0x1), region = 77 }

// kernel: forward.3
= control target key start
LH: loop header
LB: loop body
LE: loop exit
PB: predicated region body
PF: predicated region fallthrough
CT: control target
= control target key end

     0   :  { %s1078_s24 = smov 0   ;;  %s1260_s0 = inlined_call_operand.vmem [shape: bf16[512,8], index: 0, kind: input, shape index: {}]   ;;  %s1261_s1 = inlined_call_operand.vmem [shape: bf16[512,8], index: 1, kind: input, shape index: {}]   ;;  %s1262_s2 = inlined_call_operand.vmem [shape: bf16[8,4], index: 2, kind: input, shape index: {}]   ;;  %s1263_s3 = inlined_call_operand.vmem [shape: bf16[8,4], index: 3, kind: input, shape index: {}]   ;;  %s1264_s4 = inlined_call_operand.vmem [shape: f32[4,1,4], index: 4, kind: output, shape index: {0}]   ;;  %s1265_s5 = inlined_call_operand.vmem [shape: f32[4,1,4], index: 5, kind: output, shape index: {1}]   ;;  %s1266_s6 = inlined_call_operand.vmem [shape: f32[4,1,4], index: 6, kind: output, shape index: {2}]   ;;  %s1267_s7 = inlined_call_operand.vmem [shape: f32[4,1,4], index: 7, kind: output, shape index: {3}]  }
   0x1 LB: > { %s1084_s25 = sadd.s32 4294967295, %s1036_s24   ;;  %p917_p0 = scmp.ge.s32.totalorder %s1036_s24, 1  ;;  %s1036_s24 = sphi %s1078_s24, %s18_s24  }
   0x2   : > { %p256_p1 = scmp.lt.s32.totalorder %s1036_s24, 5 }
   0x4   : > { %p257_p2 = pnand %p917_p0, %p256_p1 }
   0x5   : > { %s918_s30 = sshll.u32 (!%p257_p2), %s1084_s25, 4  ;;  %p312_p4 = scmp.lt.s32.totalorder (!%p257_p2), %s1084_s25, 3 }
   0x6   : > { %260 = sbr.rel (%p257_p2) target bundleno = 233 (0xe9), region = 36  ;;  %p301_p3 = scmp.lt.s32.totalorder (!%p257_p2), %s918_s30, 63 }
   0xb   : > { %v341_v0 = vld [vmem:[%s1262_s2] sm:$0xf]  ;;  %vm407_vm0 = vcmask 1043456   ;;  %s1269_s30 = smov (!%p301_p3, %s918_s30), 63  ;;  %vm382_vm1 = vcmask 64512   ;;  %vm593_vm2 = vcmask 31744  }
   0xc   : > { %v476_v1 = vld [vmem:[%s1263_s3] sm:$0xf]  ;;  %v409_v2 = vsel %vm407_vm0, %v341_v0, 0  ;;  %s919_s8 = sshll.u32 %s1269_s30, 2  ;;  %s1271_s25 = smov (!%p312_p4, %s1084_s25), 3  ;;  %vm631_vm3 = vcmask 24576  }
   0xd   : > { %v542_v3 = vsel %vm407_vm0, %v476_v1, 0  ;;  %418 = vmatpush.bf16.msra.mxu0 %v409_v2  ;;  %1020 = vmatpush.bf16.msra.mxu2 %v409_v2  ;;  %s304_s11 = scalar_lea.vmem %s1260_s0, %s919_s8  ;;  %s310_s14 = scalar_lea.vmem %s1261_s1, %s919_s8 }
   0xe   : > { %551 = vmatpush.bf16.msra.mxu1 %v542_v3  ;;  %1021 = vmatpush.bf16.msra.mxu3 %v542_v3  ;;  %v1004_v4 = vld [vmem:[%s304_s11] sm:$0xff]  ;;  %v1005_v8 = vld [vmem:[%s304_s11 + $0x8] sm:$0xff]  ;;  %v1006_v12 = vld [vmem:[%s304_s11 + $0x10] sm:$0xff]  ;;  %s314_s17 = scalar_lea.vmem %s1264_s4, %s1271_s25  ;;  %s320_s20 = scalar_lea.vmem %s1266_s6, %s1271_s25 }
   0xf   : > { %v1012_v5 = vld [vmem:[%s310_s14] sm:$0xff]  ;;  %v1013_v9 = vld [vmem:[%s310_s14 + $0x8] sm:$0xff]  ;;  %v1014_v13 = vld [vmem:[%s310_s14 + $0x10] sm:$0xff]  ;;  %s317_s23 = scalar_lea.vmem %s1265_s5, %s1271_s25  ;;  %s323_s28 = scalar_lea.vmem %s1267_s7, %s1271_s25 }
  0x10   : > { %v1008_v6 = vld [vmem:[%s304_s11 + $0x20] sm:$0xff]  ;;  %954 = vmatmul.msk.bf16.vlgmr.msra.gmra.mxu0 %vm382_vm1, %v1004_v4  ;;  %v1009_v10 = vld [vmem:[%s304_s11 + $0x28] sm:$0xff]  ;;  %v1010_v14 = vld [vmem:[%s304_s11 + $0x30] sm:$0xff] }
  0x11   : > { %v1016_v7 = vld [vmem:[%s310_s14 + $0x20] sm:$0xff]  ;;  %994 = vmatmul.msk.bf16.vlgmr.msra.gmra.mxu1 %vm382_vm1, %v1012_v5  ;;  %958 = vmatmul.msk.bf16.vlgmr.msra.gmra.mxu2 %vm382_vm1, %v1008_v6  ;;  %v1017_v11 = vld [vmem:[%s310_s14 + $0x28] sm:$0xff]  ;;  %v1018_v15 = vld [vmem:[%s310_s14 + $0x30] sm:$0xff] }
  0x12   : > { %998 = vmatmul.msk.bf16.vlgmr.msra.gmra.mxu3 %vm382_vm1, %v1016_v7  ;;  %v1007_v16 = vld [vmem:[%s304_s11 + $0x18] sm:$0xff] }
  0x13   : > { %v1015_v17 = vld [vmem:[%s310_s14 + $0x18] sm:$0xff] }
  0x14   : > { %v1011_v18 = vld [vmem:[%s304_s11 + $0x38] sm:$0xff] }
  0x15   : > { %v1019_v19 = vld [vmem:[%s310_s14 + $0x38] sm:$0xff] }
  0x20   : > { %955 = vmatmul.msk.bf16.gmra.mxu0 %vm382_vm1, %v1005_v8 }
  0x21   : > { %995 = vmatmul.msk.bf16.gmra.mxu1 %vm382_vm1, %v1013_v9  ;;  %959 = vmatmul.msk.bf16.gmra.mxu2 %vm382_vm1, %v1009_v10 }
  0x22   : > { %999 = vmatmul.msk.bf16.gmra.mxu3 %vm382_vm1, %v1017_v11 }
  0x30   : > { %956 = vmatmul.msk.bf16.gmra.mxu0 %vm382_vm1, %v1006_v12 }
  0x31   : > { %996 = vmatmul.msk.bf16.gmra.mxu1 %vm382_vm1, %v1014_v13  ;;  %960 = vmatmul.msk.bf16.gmra.mxu2 %vm382_vm1, %v1010_v14 }
  0x32   : > { %1000 = vmatmul.msk.bf16.gmra.mxu3 %vm382_vm1, %v1018_v15 }
  0x40   : > { %957 = vmatmul.msk.bf16.gmra.mxu0 %vm382_vm1, %v1007_v16 }
  0x41   : > { %997 = vmatmul.msk.bf16.gmra.mxu1 %vm382_vm1, %v1015_v17  ;;  %961 = vmatmul.msk.bf16.gmra.mxu2 %vm382_vm1, %v1011_v18 }
  0x42   : > { %1001 = vmatmul.msk.bf16.gmra.mxu3 %vm382_vm1, %v1019_v19 }
  0x8d   : > { %v420_v20 = vpop.f32.mrf.mxu0 }
  0x8e   : > { %v553_v21 = vpop.f32.mrf.mxu1  ;;  %v633_v38 = vmul.f32 %v420_v20, %v420_v20  ;;  %v594_v42 = vsel %vm593_vm2, %v420_v20, 0.0 }
  0x8f   : > { %v725_v39 = vmul.f32 %v553_v21, %v553_v21  ;;  %v687_v43 = vsel %vm593_vm2, %v553_v21, 0.0 }
  0x90   : > { %v649_v46 = vsel %vm593_vm2, %v633_v38, 0.0 }
  0x91   : > { %v741_v47 = vsel %vm593_vm2, %v725_v39, 0.0 }
  0x94   : > { %v440_v22 = vpop.f32.mrf.mxu2 }
  0x95   : > { %v573_v23 = vpop.f32.mrf.mxu3  ;;  %v422_v24 = vpop.f32.mrf.mxu0  ;;  %v641_v45 = vmul.f32 %v440_v22, %v440_v22  ;;  %v1136_v59 = vsel %vm593_vm2, %v440_v22, 0.0 }
  0x96   : > { %v555_v25 = vpop.f32.mrf.mxu1  ;;  %v634_v40 = vmul.f32 %v422_v24, %v422_v24  ;;  %v595_v44 = vsel %vm593_vm2, %v422_v24, 0.0  ;;  %v733_v49 = vmul.f32 %v573_v23, %v573_v23  ;;  %v1139_v60 = vsel %vm593_vm2, %v573_v23, 0.0 }
  0x97   : > { %v726_v41 = vmul.f32 %v555_v25, %v555_v25  ;;  %v688_v48 = vsel %vm593_vm2, %v555_v25, 0.0  ;;  %v596_v58 = vadd.f32 %v595_v44, %v594_v42  ;;  %v1142_v62 = vsel %vm593_vm2, %v641_v45, 0.0 }
  0x98   : > { %v650_v52 = vsel %vm593_vm2, %v634_v40, 0.0  ;;  %v689_v63 = vadd.f32 %v688_v48, %v687_v43  ;;  %v1146_v4 = vsel %vm593_vm2, %v733_v49, 0.0 }
  0x99   : > { %v742_v53 = vsel %vm593_vm2, %v726_v41, 0.0  ;;  %v651_v2 = vadd.f32 %v650_v52, %v649_v46 }
  0x9a   : > { %v743_v3 = vadd.f32 %v742_v53, %v741_v47 }
  0x9c   : > { %v442_v26 = vpop.f32.mrf.mxu2 }
  0x9d   : > { %v575_v27 = vpop.f32.mrf.mxu3  ;;  %v425_v28 = vpop.f32.mrf.mxu0  ;;  %v642_v61 = vmul.f32 %v442_v26, %v442_v26  ;;  %v1152_v11 = vsel %vm593_vm2, %v442_v26, 0.0 }
  0x9e   : > { %v558_v29 = vpop.f32.mrf.mxu1  ;;  %v635_v54 = vmul.f32 %v425_v28, %v425_v28  ;;  %v597_v0 = vsel %vm593_vm2, %v425_v28, 0.0  ;;  %v734_v1 = vmul.f32 %v575_v27, %v575_v27  ;;  %v1158_v13 = vsel %vm593_vm2, %v575_v27, 0.0 }
  0x9f   : > { %v727_v55 = vmul.f32 %v558_v29, %v558_v29  ;;  %v690_v5 = vsel %vm593_vm2, %v558_v29, 0.0  ;;  %v598_v10 = vadd.f32 %v597_v0, %v596_v58  ;;  %v1155_v12 = vsel %vm593_vm2, %v642_v61, 0.0 }
  0xa0   : > { %v652_v6 = vsel %vm593_vm2, %v635_v54, 0.0  ;;  %v691_v14 = vadd.f32 %v690_v5, %v689_v63  ;;  %v1161_v15 = vsel %vm593_vm2, %v734_v1, 0.0 }
  0xa1   : > { %v744_v7 = vsel %vm593_vm2, %v727_v55, 0.0  ;;  %v653_v18 = vadd.f32 %v652_v6, %v651_v2 }
  0xa2   : > { %v745_v19 = vadd.f32 %v744_v7, %v743_v3 }
  0xa4   : > { %v445_v30 = vpop.f32.mrf.mxu2 }
  0xa5   : > { %v1117_v31 = vpop.f32.mrf.mxu3  ;;  %v427_v32 = vpop.f32.mrf.mxu0  ;;  %v1171_v25 = vsel %vm593_vm2, %v445_v30, 0.0  ;;  %v643_v26 = vmul.f32 %v445_v30, %v445_v30 }
  0xa6   : > { %v560_v33 = vpop.f32.mrf.mxu1  ;;  %v636_v8 = vmul.f32 %v427_v32, %v427_v32  ;;  %v599_v20 = vsel %vm593_vm2, %v427_v32, 0.0  ;;  %v735_v63 = vmul.f32 %v1117_v31, %v1117_v31 }
  0xa7   : > { %v728_v9 = vmul.f32 %v560_v33, %v560_v33  ;;  %v692_v21 = vsel %vm593_vm2, %v560_v33, 0.0  ;;  %v600_v40 = vadd.f32 %v599_v20, %v598_v10 }
  0xa8   : > { %v654_v24 = vsel %vm593_vm2, %v636_v8, 0.0  ;;  %v693_v41 = vadd.f32 %v692_v21, %v691_v14 }
  0xa9   : > { %v746_v27 = vsel %vm593_vm2, %v728_v9, 0.0  ;;  %v655_v47 = vadd.f32 %v654_v24, %v653_v18 }
  0xaa   : > { %v747_v48 = vadd.f32 %v746_v27, %v745_v19 }
  0xac   : > { %v1119_v34 = vpop.f32.mrf.mxu2 }
  0xad   : > { %v1121_v35 = vpop.f32.mrf.mxu3  ;;  %v430_v36 = vpop.f32.mrf.mxu0  ;;  %v644_v24 = vmul.f32 %v1119_v34, %v1119_v34 }
  0xae   : > { %v563_v37 = vpop.f32.mrf.mxu1  ;;  %v637_v16 = vmul.f32 %v430_v36, %v430_v36  ;;  %v601_v38 = vsel %vm593_vm2, %v430_v36, 0.0  ;;  %v736_v27 = vmul.f32 %v1121_v35, %v1121_v35 }
  0xaf   : > { %v729_v17 = vmul.f32 %v563_v37, %v563_v37  ;;  %v694_v32 = vsel %vm593_vm2, %v563_v37, 0.0  ;;  %v602_v49 = vadd.f32 %v601_v38, %v600_v40  ;;  %v668_v40 = vsel %vm593_vm2, %v643_v26, 0.0 }
  0xb0   : > { %v656_v42 = vsel %vm593_vm2, %v637_v16, 0.0  ;;  %v695_v36 = vadd.f32 %v694_v32, %v693_v41  ;;  %v760_v41 = vsel %vm593_vm2, %v735_v63, 0.0  ;;  %v762_v26 = vsel %vm593_vm2, %v736_v27, 0.0 }
  0xb1   : > { %v748_v43 = vsel %vm593_vm2, %v729_v17, 0.0  ;;  %v657_v55 = vadd.f32 %v656_v42, %v655_v47  ;;  %v615_v42 = vsel %vm593_vm2, %v1119_v34, 0.0 }
  0xb2   : > { %v749_v58 = vadd.f32 %v748_v43, %v747_v48  ;;  %v708_v43 = vsel %vm593_vm2, %v1121_v35, 0.0 }
  0xb4   : > { %v1129_v50 = vpop.f32.mrf.mxu2 }
  0xb5   : > { %v1131_v51 = vpop.f32.mrf.mxu3  ;;  %v432_v56 = vpop.f32.mrf.mxu0 }
  0xb6   : > { %v565_v57 = vpop.f32.mrf.mxu1  ;;  %v638_v39 = vmul.f32 %v432_v56, %v432_v56  ;;  %v603_v44 = vsel %vm593_vm2, %v432_v56, 0.0  ;;  %v737_v34 = vmul.f32 %v1131_v51, %v1131_v51 }
  0xb7   : > { %v730_v33 = vmul.f32 %v565_v57, %v565_v57  ;;  %v696_v30 = vsel %vm593_vm2, %v565_v57, 0.0  ;;  %v604_v61 = vadd.f32 %v603_v44, %v602_v49  ;;  %v706_v57 = vsel %vm593_vm2, %v1117_v31, 0.0 }
  0xb8   : > { %v658_v37 = vsel %vm593_vm2, %v638_v39, 0.0  ;;  %v697_v56 = vadd.f32 %v696_v30, %v695_v36 }
  0xb9   : > { %v750_v52 = vsel %vm593_vm2, %v730_v33, 0.0  ;;  %v659_v2 = vadd.f32 %v658_v37, %v657_v55 }
  0xba   : > { %v751_v3 = vadd.f32 %v750_v52, %v749_v58 }
  0xbc   : > { %v1165_v22 = vpop.f32.mrf.mxu2 }
  0xbd   : > { %v1167_v23 = vpop.f32.mrf.mxu3  ;;  %v435_v28 = vpop.f32.mrf.mxu0  ;;  %v646_v48 = vmul.f32 %v1165_v22, %v1165_v22 }
  0xbe   : > { %v568_v29 = vpop.f32.mrf.mxu1  ;;  %v639_v45 = vmul.f32 %v435_v28, %v435_v28  ;;  %v605_v53 = vsel %vm593_vm2, %v435_v28, 0.0  ;;  %v738_v49 = vmul.f32 %v1167_v23, %v1167_v23 }
  0xbf   : > { %v731_v46 = vmul.f32 %v568_v29, %v568_v29  ;;  %v698_v54 = vsel %vm593_vm2, %v568_v29, 0.0  ;;  %v606_v5 = vadd.f32 %v605_v53, %v604_v61 }
  0xc0   : > { %v660_v0 = vsel %vm593_vm2, %v639_v45, 0.0  ;;  %v699_v6 = vadd.f32 %v698_v54, %v697_v56  ;;  %v766_v63 = vsel %vm593_vm2, %v738_v49, 0.0 }
  0xc1   : > { %v752_v1 = vsel %vm593_vm2, %v731_v46, 0.0  ;;  %v661_v17 = vadd.f32 %v660_v0, %v659_v2  ;;  %v645_v46 = vmul.f32 %v1129_v50, %v1129_v50 }
  0xc2   : > { %v753_v18 = vadd.f32 %v752_v1, %v751_v3 }
  0xc4   : > { %v455_v31 = vpop.f32.mrf.mxu2 }
  0xc5   : > { %v437_v7 = vpop.f32.mrf.mxu0  ;;  %v588_v21 = vpop.f32.mrf.mxu3  ;;  %v647_v0 = vmul.f32 %v455_v31, %v455_v31 }
  0xc6   : > { %v570_v8 = vpop.f32.mrf.mxu1  ;;  %v607_v9 = vsel %vm593_vm2, %v437_v7, 0.0  ;;  %v640_v10 = vmul.f32 %v437_v7, %v437_v7  ;;  %v739_v1 = vmul.f32 %v588_v21, %v588_v21 }
  0xc7   : > { %v700_v14 = vsel %vm593_vm2, %v570_v8, 0.0  ;;  %v732_v16 = vmul.f32 %v570_v8, %v570_v8  ;;  %v608_v19 = vadd.f32 %v607_v9, %v606_v5 }
  0xc8   : > { %v701_v20 = vadd.f32 %v700_v14, %v699_v6  ;;  %v662_v28 = vsel %vm593_vm2, %v640_v10, 0.0 }
  0xc9   : > { %v754_v29 = vsel %vm593_vm2, %v732_v16, 0.0  ;;  %v610_v38 = vadd.f32 %v1136_v59, %v608_v19  ;;  %v663_v32 = vadd.f32 %v662_v28, %v661_v17  ;;  %v676_v17 = vsel %vm593_vm2, %v647_v0, 0.0 }
  0xca   : > { %v703_v39 = vadd.f32 %v1139_v60, %v701_v20  ;;  %v755_v33 = vadd.f32 %v754_v29, %v753_v18  ;;  %v670_v60 = vsel %vm593_vm2, %v644_v24, 0.0  ;;  %v768_v18 = vsel %vm593_vm2, %v739_v1, 0.0 }
  0xcb   : > { %v612_v44 = vadd.f32 %v1152_v11, %v610_v38  ;;  %v665_v30 = vadd.f32 %v1142_v62, %v663_v32 }
  0xcc   : > { %v705_v59 = vadd.f32 %v1158_v13, %v703_v39  ;;  %v757_v45 = vadd.f32 %v1146_v4, %v755_v33  ;;  %v617_v4 = vsel %vm593_vm2, %v1129_v50, 0.0  ;;  %v710_v13 = vsel %vm593_vm2, %v1131_v51, 0.0  ;;  %v457_v61 = vpop.f32.mrf.mxu2 }
  0xcd   : > { %v614_v35 = vadd.f32 %v1171_v25, %v612_v44  ;;  %v667_v11 = vadd.f32 %v1155_v12, %v665_v30  ;;  %v672_v12 = vsel %vm593_vm2, %v645_v46, 0.0  ;;  %v619_v50 = vsel %vm593_vm2, %v1165_v22, 0.0  ;;  %v590_v56 = vpop.f32.mrf.mxu3 }
  0xce   : > { %v707_v47 = vadd.f32 %v706_v57, %v705_v59  ;;  %v759_v62 = vadd.f32 %v1161_v15, %v757_v45  ;;  %v764_v15 = vsel %vm593_vm2, %v737_v34, 0.0  ;;  %v712_v51 = vsel %vm593_vm2, %v1167_v23, 0.0 }
  0xcf   : > { %v669_v36 = vadd.f32 %v668_v40, %v667_v11  ;;  %v616_v37 = vadd.f32 %v615_v42, %v614_v35  ;;  %v674_v57 = vsel %vm593_vm2, %v646_v48, 0.0  ;;  %v621_v22 = vsel %vm593_vm2, %v455_v31, 0.0 }
  0xd0   : > { %v761_v25 = vadd.f32 %v760_v41, %v759_v62  ;;  %v709_v52 = vadd.f32 %v708_v43, %v707_v47  ;;  %v714_v23 = vsel %vm593_vm2, %v588_v21, 0.0  ;;  %v648_v7 = vmul.f32 %v457_v61, %v457_v61 }
  0xd1   : > { %v618_v53 = vadd.f32 %v617_v4, %v616_v37  ;;  %v671_v54 = vadd.f32 %v670_v60, %v669_v36  ;;  %v740_v8 = vmul.f32 %v590_v56, %v590_v56  ;;  %v623_v19 = vsel %vm593_vm2, %v457_v61, 0.0 }
  0xd2   : > { %v711_v55 = vadd.f32 %v710_v13, %v709_v52  ;;  %v763_v58 = vadd.f32 %v762_v26, %v761_v25  ;;  %v716_v20 = vsel %vm593_vm2, %v590_v56, 0.0  ;;  %v678_v21 = vsel %vm593_vm2, %v648_v7, 0.0 }
  0xd3   : > { %v620_v2 = vadd.f32 %v619_v50, %v618_v53  ;;  %v673_v3 = vadd.f32 %v672_v12, %v671_v54  ;;  %v770_v29 = vsel %vm593_vm2, %v740_v8, 0.0 }
  0xd4   : > { %v713_v5 = vadd.f32 %v712_v51, %v711_v55  ;;  %v765_v6 = vadd.f32 %v764_v15, %v763_v58 }
  0xd5   : > { %v622_v9 = vadd.f32 %v621_v22, %v620_v2  ;;  %v675_v10 = vadd.f32 %v674_v57, %v673_v3 }
  0xd6   : > { %v715_v14 = vadd.f32 %v714_v23, %v713_v5  ;;  %v767_v16 = vadd.f32 %v766_v63, %v765_v6 }
  0xd7   : > { %v677_v24 = vadd.f32 %v676_v17, %v675_v10  ;;  %v624_v31 = vadd.f32 %v623_v19, %v622_v9 }
  0xd8   : > { %v769_v27 = vadd.f32 %v768_v18, %v767_v16  ;;  %v717_v28 = vadd.f32 %v716_v20, %v715_v14 }
  0xd9   : > { %v625_v38 = vrot.slane %v624_v31, 4  ;;  %v679_v32 = vadd.f32 %v678_v21, %v677_v24 }
  0xda   : > { %v718_v39 = vrot.slane %v717_v28, 4  ;;  %v771_v33 = vadd.f32 %v770_v29, %v769_v27 }
  0xdb   : > { %v626_v40 = vadd.f32 %v625_v38, %v624_v31  ;;  %v680_v41 = vrot.slane %v679_v32, 4 }
  0xdc   : > { %v719_v42 = vadd.f32 %v718_v39, %v717_v28  ;;  %v772_v43 = vrot.slane %v771_v33, 4 }
  0xdd   : > { %v627_v44 = vrot.slane %v626_v40, 2  ;;  %v681_v30 = vadd.f32 %v680_v41, %v679_v32 }
  0xde   : > { %v720_v59 = vrot.slane %v719_v42, 2  ;;  %v773_v45 = vadd.f32 %v772_v43, %v771_v33 }
  0xdf   : > { %v628_v60 = vadd.f32 %v627_v44, %v626_v40  ;;  %v682_v26 = vrot.slane %v681_v30, 2 }
  0xe0   : > { %v721_v46 = vadd.f32 %v720_v59, %v719_v42  ;;  %v774_v34 = vrot.slane %v773_v45, 2 }
  0xe1   : > { %v629_v35 = vrot.slane %v628_v60, 1  ;;  %v683_v11 = vadd.f32 %v682_v26, %v681_v30 }
  0xe2   : > { %v722_v47 = vrot.slane %v721_v46, 1  ;;  %v775_v62 = vadd.f32 %v774_v34, %v773_v45 }
  0xe3   : > { %v630_v4 = vadd.f32 %v629_v35, %v628_v60  ;;  %v684_v13 = vrot.slane %v683_v11, 1 }
  0xe4   : > { %v723_v48 = vadd.f32 %v722_v47, %v721_v46  ;;  %v776_v49 = vrot.slane %v775_v62, 1 }
  0xe5   : > { %632 = vst.msk [vmem:[%s314_s17] sm:$0x1] %vm631_vm3, %v630_v4  ;;  %v685_v36 = vadd.f32 %v684_v13, %v683_v11 }
  0xe6   : > { %v777_v37 = vadd.f32 %v776_v49, %v775_v62  ;;  %724 = vst.msk [vmem:[%s320_s20] sm:$0x1] %vm631_vm3, %v723_v48 }
  0xe7   : > { %686 = vst.msk [vmem:[%s317_s23] sm:$0x1] %vm631_vm3, %v685_v36 }
  0xe8   : > { %778 = vst.msk [vmem:[%s323_s28] sm:$0x1] %vm631_vm3, %v777_v37 }
  0xe9 PF: > { %s18_s24 = sadd.s32 1, %s1036_s24  }
  0xea   : > { %p15_p5 = scmp.ge.s32.totalorder %s18_s24, 6  }
  0xec   :  { %17 = sbr.rel (!%p15_p5) target bundleno = 1 (0x1), region = 105 }

// kernel: forward.5
= control target key start
LH: loop header
LB: loop body
LE: loop exit
PB: predicated region body
PF: predicated region fallthrough
CT: control target
= control target key end

     0   :  { %s931_s19 = smov 0   ;;  %s1304_s0 = inlined_call_operand.vmem [shape: f32[512,8], index: 0, kind: input, shape index: {}]   ;;  %s1305_s1 = inlined_call_operand.vmem [shape: f32[512,1], index: 1, kind: input, shape index: {}]   ;;  %s1306_s2 = inlined_call_operand.<no memory space> [shape: f32[1,1], index: 2, kind: input, shape index: {}]   ;;  %s1307_s4 = inlined_call_operand.vmem [shape: f32[512,8], index: 4, kind: output, shape index: {}]   ;;  %s1308_s3 = inlined_call_operand.<no memory space> [shape: f32[1,1], index: 3, kind: input, shape index: {}]  }
   0x1   :  { %v9_v0 = vstv %s1306_s2  ;;  %v11_v1 = vstv %s1308_s3 }
   0x2   :  { %10 = vst [vmem:[#allocation2] sm:$0x1] %v9_v0 }
   0x3   :  { %12 = vst [vmem:[#allocation3] sm:$0x1] %v11_v1 }
   0x4 LB: > { %s782_s20 = sadd.s32 4294967295, %s897_s19   ;;  %p786_p0 = scmp.ge.s32.totalorder %s897_s19, 1  ;;  %s897_s19 = sphi %s931_s19, %s18_s19  }
   0x5   : > { %p178_p1 = scmp.lt.s32.totalorder %s897_s19, 5 }
   0x7   : > { %p179_p2 = pnand %p786_p0, %p178_p1 }
   0x8   : > { %s787_s2 = sshll.u32 (!%p179_p2), %s782_s20, 4 }
   0x9   : > { %182 = sbr.rel (%p179_p2) target bundleno = 267 (0x10b), region = 36  ;;  %p210_p3 = scmp.lt.s32.totalorder (!%p179_p2), %s787_s2, 63 }
   0xe   : > { %v243_v2 = vld [vmem:[#allocation2] sm:$0x1]  ;;  %v262_v3 = vld [vmem:[#allocation3] sm:$0x1]  ;;  %v899_v4 = vmov 0   ;;  %s1332_s2 = smov (!%p210_p3, %s787_s2), 63 }
   0xf   : > { %811 = vpush %v243_v2  ;;  %826 = vset.pattern.permute.xlu2 %v899_v4  ;;  %825 = vset.pattern.permute.xlu1 %v899_v4  ;;  %s939_s3 = sshll.u32 %s1332_s2, 3 }
  0x10   : > { %813 = vpush %v262_v3  ;;  %824 = vset.pattern.permute.xlu0 %v899_v4  ;;  %s945_s23 = scalar_lea.vmem %s1305_s1, %s939_s3  ;;  %s1245_s28 = scalar_lea.vmem %s1304_s0, %s939_s3 }
  0x11   : > { %v231_v5 = vld [vmem:[%s945_s23 + $0x20] sm:$0xff]  ;;  %v229_v6 = vld [vmem:[%s945_s23 + $0x10] sm:$0xff]  ;;  %v232_v8 = vld [vmem:[%s945_s23 + $0x28] sm:$0xff]  ;;  %s1252_s5 = scalar_lea.vmem %s1307_s4, %s939_s3 }
  0x12   : > { %v227_v7 = vld [vmem:[%s945_s23] sm:$0xff]  ;;  %v230_v9 = vld [vmem:[%s945_s23 + $0x18] sm:$0xff]  ;;  %v228_v10 = vld [vmem:[%s945_s23 + $0x8] sm:$0xff] }
  0x13   : > { %v235_v12 = vld [vmem:[%s945_s23 + $0x40] sm:$0xff]  ;;  %v234_v24 = vld [vmem:[%s945_s23 + $0x38] sm:$0xff]  ;;  %v233_v28 = vld [vmem:[%s945_s23 + $0x30] sm:$0xff] }
  0x14   : > { %v238_v37 = vld [vmem:[%s945_s23 + $0x58] sm:$0xff]  ;;  %v237_v39 = vld [vmem:[%s945_s23 + $0x50] sm:$0xff]  ;;  %v236_v40 = vld [vmem:[%s945_s23 + $0x48] sm:$0xff] }
  0x15   : > { %v241_v43 = vld [vmem:[%s945_s23 + $0x70] sm:$0xff]  ;;  %v240_v47 = vld [vmem:[%s945_s23 + $0x68] sm:$0xff] }
  0x40   : > { %s812_s24 = spop %811 }
  0x41   : > { %v953_v11 = vstv %s812_s24  ;;  %s814_s25 = spop %813 }
  0x42   : > { %v956_v13 = vstv %s814_s25  ;;  %v250_v14 = vmul.f32 %v953_v11, %v231_v5  ;;  %v248_v15 = vmul.f32 %v953_v11, %v229_v6  ;;  %v246_v16 = vmul.f32 %v953_v11, %v227_v7  ;;  %v239_v7 = vld [vmem:[%s945_s23 + $0x60] sm:$0xff] }
  0x43   : > { %v251_v17 = vmul.f32 %v953_v11, %v232_v8  ;;  %v249_v18 = vmul.f32 %v953_v11, %v230_v9  ;;  %v247_v19 = vmul.f32 %v953_v11, %v228_v10  ;;  %v254_v23 = vmul.f32 %v953_v11, %v235_v12 }
  0x44   : > { %v269_v20 = vadd.f32 %v956_v13, %v250_v14  ;;  %v267_v21 = vadd.f32 %v956_v13, %v248_v15  ;;  %v265_v22 = vadd.f32 %v956_v13, %v246_v16  ;;  %v253_v33 = vmul.f32 %v953_v11, %v234_v24 }
  0x45   : > { %v270_v25 = vadd.f32 %v956_v13, %v251_v17  ;;  %v268_v26 = vadd.f32 %v956_v13, %v249_v18  ;;  %v266_v27 = vadd.f32 %v956_v13, %v247_v19  ;;  %v273_v35 = vadd.f32 %v956_v13, %v254_v23 }
  0x46   : > { %v797_v29 = vmul.f32 -1.442695, %v269_v20  ;;  %v795_v30 = vmul.f32 -1.442695, %v267_v21  ;;  %v793_v31 = vmul.f32 -1.442695, %v265_v22  ;;  %v252_v36 = vmul.f32 %v953_v11, %v233_v28 }
  0x47   : > { %v798_v32 = vmul.f32 -1.442695, %v270_v25  ;;  %v796_v34 = vmul.f32 -1.442695, %v268_v26  ;;  %v794_v38 = vmul.f32 -1.442695, %v266_v27  ;;  %v272_v41 = vadd.f32 %v956_v13, %v253_v33 }
  0x48   : > { %827 = vpow2.f32 %v797_v29  ;;  %v257_v42 = vmul.f32 %v953_v11, %v238_v37  ;;  %v801_v44 = vmul.f32 -1.442695, %v273_v35  ;;  %v271_v45 = vadd.f32 %v956_v13, %v252_v36 }
  0x49   : > { %829 = vpow2.f32 %v795_v30  ;;  %v256_v46 = vmul.f32 %v953_v11, %v237_v39  ;;  %v255_v48 = vmul.f32 %v953_v11, %v236_v40  ;;  %v260_v50 = vmul.f32 %v953_v11, %v241_v43  ;;  %v242_v40 = vld [vmem:[%s945_s23 + $0x78] sm:$0xff] }
  0x4a   : > { %831 = vpow2.f32 %v793_v31  ;;  %v800_v53 = vmul.f32 -1.442695, %v272_v41  ;;  %v276_v54 = vadd.f32 %v956_v13, %v257_v42  ;;  %v259_v55 = vmul.f32 %v953_v11, %v240_v47 }
  0x4b   : > { %833 = vpow2.f32 %v798_v32  ;;  %v799_v58 = vmul.f32 -1.442695, %v271_v45  ;;  %v275_v59 = vadd.f32 %v956_v13, %v256_v46  ;;  %v274_v61 = vadd.f32 %v956_v13, %v255_v48 }
  0x4c   : > { %835 = vpow2.f32 %v796_v34  ;;  %v279_v63 = vadd.f32 %v956_v13, %v260_v50  ;;  %v278_v3 = vadd.f32 %v956_v13, %v259_v55  ;;  %v1005_v5 = vmul.f32 -1.442695, %v276_v54 }
  0x4d   : > { %837 = vpow2.f32 %v794_v38  ;;  %v1007_v6 = vmul.f32 -1.442695, %v275_v59  ;;  %v1013_v10 = vmul.f32 -1.442695, %v274_v61  ;;  %v1026_v20 = vmul.f32 %v953_v11, %v239_v7 }
  0x4e   : > { %v828_v49 = vpop.eup %827  ;;  %839 = vpow2.f32 %v801_v44  ;;  %v1021_v18 = vmul.f32 -1.442695, %v279_v63  ;;  %v1023_v19 = vmul.f32 -1.442695, %v278_v3 }
  0x4f   : > { %v830_v51 = vpop.eup %829  ;;  %v987_v52 = vadd.f32 1.0, %v828_v49 }
  0x50   : > { %v832_v56 = vpop.eup %831  ;;  %v991_v57 = vadd.f32 1.0, %v830_v51 }
  0x51   : > { %v834_v60 = vpop.eup %833  ;;  %841 = vrcp.f32 %v987_v52  ;;  %v998_v1 = vadd.f32 1.0, %v832_v56  ;;  %v414_v8 = vand.u32 2147483647, %v987_v52  ;;  %v416_v9 = vand.u32 2147483648, %v987_v52 }
  0x52   : > { %v836_v62 = vpop.eup %835  ;;  %843 = vrcp.f32 %v991_v57  ;;  %v1000_v2 = vadd.f32 1.0, %v834_v60  ;;  %v384_v14 = vand.u32 2147483647, %v991_v57  ;;  %v386_v15 = vand.u32 2147483648, %v991_v57 }
  0x53   : > { %v838_v0 = vpop.eup %837  ;;  %845 = vpow2.f32 %v800_v53  ;;  %v1003_v4 = vadd.f32 1.0, %v836_v62  ;;  %vm410_vm0 = vweird.f32 %v987_v52  ;;  %v354_v23 = vand.u32 2147483647, %v998_v1 }
  0x54   : > { %847 = vpow2.f32 %v799_v58  ;;  %v840_v12 = vpop.eup %839  ;;  %v1018_v16 = vadd.f32 1.0, %v838_v0  ;;  %v356_v24 = vand.u32 2147483648, %v998_v1  ;;  %vm1032_vm1 = vcmp.eq.f32.partialorder %v414_v8, 8.507059e+37 }
  0x55   : > { %849 = vrcp.f32 %v998_v1  ;;  %v417_v27 = vor.u32 1.1754944e-38, %v416_v9  ;;  %vm380_vm2 = vweird.f32 %v991_v57  ;;  %vm1038_vm3 = vcmp.eq.f32.partialorder %v384_v14, 8.507059e+37 }
  0x56   : > { %851 = vrcp.f32 %v1000_v2  ;;  %v387_v32 = vor.u32 1.1754944e-38, %v386_v15  ;;  %vm350_vm4 = vweird.f32 %v998_v1  ;;  %v429_v35 = vand.u32 2147483647, %v1000_v2 }
  0x57   : > { %v842_v17 = vpop.eup %841  ;;  %853 = vrcp.f32 %v1003_v4  ;;  %v431_v36 = vand.u32 2147483648, %v1000_v2  ;;  %vm1049_vm6 = vcmp.eq.f32.partialorder %v354_v23, 8.507059e+37  ;;  %v357_v41 = vor.u32 1.1754944e-38, %v356_v24 }
  0x58   : > { %v844_v21 = vpop.eup %843  ;;  %v406_v22 = vmul.f32 %v842_v17, %v987_v52  ;;  %855 = vrcp.f32 %v1018_v16  ;;  %vm411_vm5 = vweird.f32 %v842_v17  ;;  %vm425_vm7 = vweird.f32 %v1000_v2 }
  0x59   : > { %v846_v25 = vpop.eup %845  ;;  %v376_v28 = vmul.f32 %v844_v21, %v991_v57  ;;  %vm381_vm8 = vweird.f32 %v844_v21  ;;  %vm395_vm9 = vweird.f32 %v1003_v4  ;;  %v399_v48 = vand.u32 2147483647, %v1003_v4  ;;  %vm412_vm10 = vmor %vm410_vm0, %vm411_vm5 }
  0x5a   : > { %v848_v29 = vpop.eup %847  ;;  %v407_v30 = vsub.f32 1.0, %v406_v22  ;;  %v1064_v51 = vadd.f32 1.0, %v840_v12  ;;  %vm382_vm12 = vmor %vm380_vm2, %vm381_vm8  ;;  %v1070_v58 = vadd.f32 1.0, %v846_v25  ;;  %v401_v9 = vand.u32 2147483648, %v1003_v4 }
  0x5b   : > { %v850_v33 = vpop.eup %849  ;;  %v377_v34 = vsub.f32 1.0, %v376_v28  ;;  %v1089_v12 = vadd.f32 1.0, %v848_v29  ;;  %v371_v22 = vand.u32 2147483648, %v1018_v16  ;;  %v432_v23 = vor.u32 1.1754944e-38, %v431_v36 }
  0x5c   : > { %v1046_v37 = vpop.eup %851  ;;  %v408_v38 = vmul.f32 %v842_v17, %v407_v30  ;;  %v346_v39 = vmul.f32 %v850_v33, %v998_v1  ;;  %vm351_vm11 = vweird.f32 %v850_v33  ;;  %857 = vrcp.f32 %v1064_v51 }
  0x5d   : > { %v1054_v42 = vpop.eup %853  ;;  %v378_v43 = vmul.f32 %v844_v21, %v377_v34  ;;  %v421_v44 = vmul.f32 %v1046_v37, %v1000_v2  ;;  %vm426_vm13 = vweird.f32 %v1046_v37  ;;  %vm352_vm14 = vmor %vm350_vm4, %vm351_vm11  ;;  %859 = vrcp.f32 %v1070_v58 }
  0x5e   : > { %v409_v45 = vadd.f32 %v842_v17, %v408_v38  ;;  %v347_v46 = vsub.f32 1.0, %v346_v39  ;;  %v391_v47 = vmul.f32 %v1054_v42, %v1003_v4  ;;  %v1066_v53 = vpop.eup %855  ;;  %vm396_vm15 = vweird.f32 %v1054_v42  ;;  %vm1095_vm0 = vmor %vm425_vm7, %vm426_vm13 }
  0x5f   : > { %v379_v49 = vadd.f32 %v844_v21, %v378_v43  ;;  %v422_v50 = vsub.f32 1.0, %v421_v44  ;;  %v361_v61 = vmul.f32 %v1066_v53, %v1018_v16  ;;  %vm1109_vm2 = vmor %vm395_vm9, %vm396_vm15  ;;  %v474_v26 = vand.u32 2147483647, %v1064_v51 }
  0x60   : > { %v413_v54 = vsel %vm412_vm10, %v842_v17, %v409_v45  ;;  %v348_v55 = vmul.f32 %v850_v33, %v347_v46  ;;  %v392_v56 = vsub.f32 1.0, %v391_v47  ;;  %v369_v17 = vand.u32 2147483647, %v1018_v16 }
  0x61   : > { %v418_v59 = vsel %vm1032_vm1, %v417_v27, %v413_v54  ;;  %v383_v52 = vsel %vm382_vm12, %v844_v21, %v379_v49  ;;  %v423_v60 = vmul.f32 %v1046_v37, %v422_v50  ;;  %v362_v3 = vsub.f32 1.0, %v361_v61 }
  0x62   : > { %623 = vperm.xlu2 %826, %v418_v59   ;;  %v388_v62 = vsel %vm1038_vm3, %v387_v32, %v383_v52  ;;  %v349_v63 = vadd.f32 %v850_v33, %v348_v55  ;;  %v393_v57 = vmul.f32 %v1054_v42, %v392_v56  ;;  %vm430_vm1 = vcmp.eq.f32.partialorder %v429_v35, 8.507059e+37  ;;  %v858_v28 = vpop.eup %857 }
  0x63   : > { %613 = vperm.xlu1 %825, %v388_v62   ;;  %v424_v0 = vadd.f32 %v1046_v37, %v423_v60  ;;  %v363_v15 = vmul.f32 %v1066_v53, %v362_v3  ;;  %vm366_vm3 = vweird.f32 %v1066_v53  ;;  %v402_v27 = vor.u32 1.1754944e-38, %v401_v9  ;;  %v860_v35 = vpop.eup %859 }
  0x64   : > { %v353_v7 = vsel %vm352_vm14, %v850_v33, %v349_v63  ;;  %v394_v8 = vadd.f32 %v1054_v42, %v393_v57  ;;  %vm365_vm4 = vweird.f32 %v1018_v16  ;;  %v476_v4 = vand.u32 2147483648, %v1064_v51 }
  0x65   : > { %v358_v14 = vsel %vm1049_vm6, %v357_v41, %v353_v7  ;;  %v428_v21 = vsel %vm1095_vm0, %v1046_v37, %v424_v0  ;;  %v364_v25 = vadd.f32 %v1066_v53, %v363_v15  ;;  %861 = vrcp.f32 %v1089_v12  ;;  %vm1123_vm6 = vmor %vm365_vm4, %vm366_vm3 }
  0x66   : > { %603 = vperm.xlu0 %824, %v358_v14   ;;  %v398_v24 = vsel %vm1109_vm2, %v1054_v42, %v394_v8  ;;  %v433_v29 = vsel %vm430_vm1, %v432_v23, %v428_v21  ;;  %vm400_vm5 = vcmp.eq.f32.partialorder %v399_v48, 8.507059e+37  ;;  %vm1127_vm7 = vcmp.eq.f32.partialorder %v369_v17, 8.507059e+37 }
  0x67   : > { %863 = vpow2.f32 %v1005_v5  ;;  %v403_v16 = vsel %vm400_vm5, %v402_v27, %v398_v24  ;;  %v368_v32 = vsel %vm1123_vm6, %v1066_v53, %v364_v25  ;;  %v372_v33 = vor.u32 1.1754944e-38, %v371_v22 }
  0x68   : > { %v466_v34 = vmul.f32 %v858_v28, %v1064_v51  ;;  %vm470_vm8 = vweird.f32 %v1064_v51  ;;  %vm1137_vm9 = vcmp.eq.f32.partialorder %v474_v26, 8.507059e+37  ;;  %865 = vpow2.f32 %v1007_v6 }
  0x69   : > { %v277_v5 = vadd.f32 %v956_v13, %v1026_v20  ;;  %v477_v38 = vor.u32 1.1754944e-38, %v476_v4  ;;  %v451_v39 = vmul.f32 %v860_v35, %v1070_v58  ;;  %867 = vpow2.f32 %v1013_v10 }
  0x6a   : > { %628 = vperm.xlu2 %826, %v433_v29   ;;  %v467_v37 = vsub.f32 1.0, %v466_v34  ;;  %v373_v41 = vsel %vm1127_vm7, %v372_v33, %v368_v32  ;;  %vm455_vm10 = vweird.f32 %v1070_v58  ;;  %869 = vpow2.f32 %v1021_v18 }
  0x6b   : > { %618 = vperm.xlu1 %825, %v403_v16   ;;  %v805_v42 = vmul.f32 -1.442695, %v277_v5  ;;  %v862_v43 = vpop.eup %861  ;;  %vm471_vm11 = vweird.f32 %v858_v28  ;;  %v452_v20 = vsub.f32 1.0, %v451_v39  ;;  %v461_v44 = vand.u32 2147483648, %v1070_v58 }
  0x6c   : > { %v468_v6 = vmul.f32 %v858_v28, %v467_v37  ;;  %vm456_vm12 = vweird.f32 %v860_v35  ;;  %v459_v10 = vand.u32 2147483647, %v1070_v58  ;;  %v436_v46 = vmul.f32 %v862_v43, %v1089_v12  ;;  %vm472_vm13 = vmor %vm470_vm8, %vm471_vm11 }
  0x6d   : > { %v864_v45 = vpop.eup %863  ;;  %v261_v47 = vmul.f32 %v953_v11, %v242_v40  ;;  %v453_v49 = vmul.f32 %v860_v35, %v452_v20  ;;  %871 = vpow2.f32 %v1023_v19  ;;  %v444_v54 = vand.u32 2147483647, %v1089_v12  ;;  %vm457_vm14 = vmor %vm455_vm10, %vm456_vm12 }
  0x6e   : > { %608 = vperm.xlu0 %824, %v373_v41   ;;  %v469_v48 = vadd.f32 %v858_v28, %v468_v6  ;;  %v1155_v50 = vadd.f32 1.0, %v864_v45  ;;  %v866_v18 = vpop.eup %865  ;;  %v437_v53 = vsub.f32 1.0, %v436_v46  ;;  %v446_v55 = vand.u32 2147483648, %v1089_v12 }
  0x6f   : > { %873 = vpow2.f32 %v805_v42  ;;  %v868_v56 = vpop.eup %867  ;;  %v454_v52 = vadd.f32 %v860_v35, %v453_v49  ;;  %v462_v11 = vor.u32 1.1754944e-38, %v461_v44  ;;  %vm441_vm15 = vweird.f32 %v862_v43  ;;  %v596_v42 = vld [vmem:[%s1245_s28 + $0x58] sm:$0xff] }
  0x70   : > { %v473_v59 = vsel %vm472_vm13, %v858_v28, %v469_v48  ;;  %875 = vrcp.f32 %v1155_v50  ;;  %v870_v60 = vpop.eup %869  ;;  %v438_v51 = vmul.f32 %v862_v43, %v437_v53  ;;  %v280_v61 = vadd.f32 %v956_v13, %v261_v47 }
  0x71   : > { %v478_v19 = vsel %vm1137_vm9, %v477_v38, %v473_v59  ;;  %v458_v62 = vsel %vm457_vm14, %v860_v35, %v454_v52  ;;  %vm460_vm0 = vcmp.eq.f32.partialorder %v459_v10, 8.507059e+37  ;;  %v1169_v63 = vadd.f32 1.0, %v866_v18 }
  0x72   : > { %643 = vperm.xlu2 %826, %v478_v19   ;;  %v1171_v57 = vadd.f32 1.0, %v868_v56  ;;  %v463_v0 = vsel %vm460_vm0, %v462_v11, %v458_v62  ;;  %v439_v3 = vadd.f32 %v862_v43, %v438_v51  ;;  %vm440_vm1 = vweird.f32 %v1089_v12 }
  0x73   : > { %v1174_v7 = vadd.f32 1.0, %v870_v60  ;;  %v872_v8 = vpop.eup %871  ;;  %638 = vperm.xlu1 %825, %v463_v0   ;;  %vm442_vm2 = vmor %vm440_vm1, %vm441_vm15  ;;  %v447_v58 = vor.u32 1.1754944e-38, %v446_v55  ;;  %877 = vrcp.f32 %v1169_v63  ;;  %vm445_vm3 = vcmp.eq.f32.partialorder %v444_v54, 8.507059e+37 }
  0x74   : > { %v443_v9 = vsel %vm442_vm2, %v862_v43, %v439_v3  ;;  %879 = vrcp.f32 %v1171_v57  ;;  %v808_v14 = vmul.f32 -1.442695, %v280_v61  ;;  %v519_v17 = vand.u32 2147483647, %v1155_v50 }
  0x75   : > { %v874_v13 = vpop.eup %873  ;;  %v448_v15 = vsel %vm445_vm3, %v447_v58, %v443_v9  ;;  %881 = vrcp.f32 %v1174_v7  ;;  %vm515_vm4 = vweird.f32 %v1155_v50  ;;  %v521_v21 = vand.u32 2147483648, %v1155_v50 }
  0x76   : > { %v876_v1 = vpop.eup %875  ;;  %633 = vperm.xlu0 %824, %v448_v15   ;;  %v1183_v22 = vadd.f32 1.0, %v872_v8  ;;  %v1185_v23 = vadd.f32 1.0, %v874_v13  ;;  %883 = vpow2.f32 %v808_v14  ;;  %vm1187_vm5 = vcmp.eq.f32.partialorder %v519_v17, 8.507059e+37 }
  0x77   : > { %v511_v12 = vmul.f32 %v876_v1, %v1155_v50  ;;  %v504_v26 = vand.u32 2147483647, %v1169_v63  ;;  %v506_v27 = vand.u32 2147483648, %v1169_v63  ;;  %v489_v4 = vand.u32 2147483647, %v1171_v57 }
  0x78   : > { %vm516_vm6 = vweird.f32 %v876_v1  ;;  %885 = vrcp.f32 %v1183_v22  ;;  %v522_v31 = vor.u32 1.1754944e-38, %v521_v21  ;;  %vm500_vm7 = vweird.f32 %v1169_v63 }
  0x79   : > { %v512_v2 = vsub.f32 1.0, %v511_v12  ;;  %v878_v24 = vpop.eup %877  ;;  %vm485_vm8 = vweird.f32 %v1171_v57  ;;  %v491_v35 = vand.u32 2147483648, %v1171_v57  ;;  %887 = vrcp.f32 %v1185_v23  ;;  %vm517_vm9 = vmor %vm515_vm4, %vm516_vm6 }
  0x7a   : > { %v880_v28 = vpop.eup %879  ;;  %v496_v30 = vmul.f32 %v878_v24, %v1169_v63  ;;  %vm1203_vm10 = vcmp.eq.f32.partialorder %v504_v26, 8.507059e+37  ;;  %v507_v5 = vor.u32 1.1754944e-38, %v506_v27  ;;  %vm501_vm11 = vweird.f32 %v878_v24 }
  0x7b   : > { %v513_v29 = vmul.f32 %v876_v1, %v512_v2  ;;  %v481_v16 = vmul.f32 %v880_v28, %v1171_v57  ;;  %v882_v32 = vpop.eup %881  ;;  %vm1208_vm12 = vcmp.eq.f32.partialorder %v489_v4, 8.507059e+37  ;;  %vm486_vm13 = vweird.f32 %v880_v28  ;;  %vm502_vm14 = vmor %vm500_vm7, %vm501_vm11 }
  0x7c   : > { %v497_v34 = vsub.f32 1.0, %v496_v30  ;;  %v556_v38 = vmul.f32 %v882_v32, %v1174_v7  ;;  %v884_v39 = vpop.eup %883  ;;  %v492_v10 = vor.u32 1.1754944e-38, %v491_v35  ;;  %v566_v46 = vand.u32 2147483648, %v1174_v7  ;;  %vm487_vm0 = vmor %vm485_vm8, %vm486_vm13 }
  0x7d   : > { %v514_v33 = vadd.f32 %v876_v1, %v513_v29  ;;  %v482_v37 = vsub.f32 1.0, %v481_v16  ;;  %v1215_v47 = vadd.f32 1.0, %v884_v39  ;;  %vm561_vm15 = vweird.f32 %v882_v32  ;;  %v589_v29 = vld [vmem:[%s1245_s28 + $0x20] sm:$0xff]  ;;  %v590_v16 = vld [vmem:[%s1245_s28 + $0x28] sm:$0xff] }
  0x7e   : > { %v498_v41 = vmul.f32 %v878_v24, %v497_v34  ;;  %v557_v20 = vsub.f32 1.0, %v556_v38  ;;  %v886_v44 = vpop.eup %885  ;;  %vm560_vm1 = vweird.f32 %v1174_v7  ;;  %v564_v54 = vand.u32 2147483647, %v1174_v7  ;;  %v593_v34 = vld [vmem:[%s1245_s28 + $0x40] sm:$0xff] }
  0x7f   : > { %v518_v40 = vsel %vm517_vm9, %v876_v1, %v514_v33  ;;  %v483_v6 = vmul.f32 %v880_v28, %v482_v37  ;;  %v541_v50 = vmul.f32 %v886_v44, %v1183_v22  ;;  %v888_v18 = vpop.eup %887  ;;  %889 = vrcp.f32 %v1215_v47  ;;  %vm562_vm2 = vmor %vm560_vm1, %vm561_vm15  ;;  %v585_v39 = vld [vmem:[%s1245_s28] sm:$0xff] }
  0x80   : > { %v523_v43 = vsel %vm1187_vm5, %v522_v31, %v518_v40  ;;  %v499_v45 = vadd.f32 %v878_v24, %v498_v41  ;;  %v558_v49 = vmul.f32 %v882_v32, %v557_v20  ;;  %v567_v60 = vor.u32 1.1754944e-38, %v566_v46 }
  0x81   : > { %658 = vperm.xlu2 %826, %v523_v43   ;;  %v484_v48 = vadd.f32 %v880_v28, %v483_v6  ;;  %v542_v52 = vsub.f32 1.0, %v541_v50  ;;  %v526_v19 = vmul.f32 %v888_v18, %v1185_v23  ;;  %vm546_vm3 = vweird.f32 %v886_v44  ;;  %v588_v43 = vld [vmem:[%s1245_s28 + $0x18] sm:$0xff] }
  0x82   : > { %v503_v53 = vsel %vm502_vm14, %v878_v24, %v499_v45  ;;  %v559_v59 = vadd.f32 %v882_v32, %v558_v49  ;;  %v551_v62 = vand.u32 2147483648, %v1183_v22  ;;  %vm565_vm4 = vcmp.eq.f32.partialorder %v564_v54, 8.507059e+37 }
  0x83   : > { %v508_v55 = vsel %vm1203_vm10, %v507_v5, %v503_v53  ;;  %v488_v56 = vsel %vm487_vm0, %v880_v28, %v484_v48  ;;  %v543_v61 = vmul.f32 %v886_v44, %v542_v52  ;;  %v549_v63 = vand.u32 2147483647, %v1183_v22  ;;  %v587_v5 = vld [vmem:[%s1245_s28 + $0x10] sm:$0xff] }
  0x84   : > { %653 = vperm.xlu1 %825, %v508_v55   ;;  %v493_v11 = vsel %vm1208_vm12, %v492_v10, %v488_v56  ;;  %v563_v51 = vsel %vm562_vm2, %v882_v32, %v559_v59  ;;  %v527_v57 = vsub.f32 1.0, %v526_v19  ;;  %vm545_vm5 = vweird.f32 %v1183_v22  ;;  %v586_v10 = vld [vmem:[%s1245_s28 + $0x8] sm:$0xff]  ;;  %v599_v48 = vld [vmem:[%s1245_s28 + $0x70] sm:$0xff] }
  0x85   : > { %648 = vperm.xlu0 %824, %v493_v11   ;;  %v568_v0 = vsel %vm565_vm4, %v567_v60, %v563_v51  ;;  %v544_v3 = vadd.f32 %v886_v44, %v543_v61  ;;  %v536_v7 = vand.u32 2147483648, %v1185_v23  ;;  %v890_v8 = vpop.eup %889  ;;  %vm547_vm6 = vmor %vm545_vm5, %vm546_vm3  ;;  %vm531_vm7 = vweird.f32 %v888_v18  ;;  %v591_v55 = vld [vmem:[%s1245_s28 + $0x30] sm:$0xff]  ;;  %v594_v11 = vld [vmem:[%s1245_s28 + $0x48] sm:$0xff] }
  0x86   : > { %v528_v58 = vmul.f32 %v888_v18, %v527_v57  ;;  %v534_v13 = vand.u32 2147483647, %v1185_v23  ;;  %v552_v14 = vor.u32 1.1754944e-38, %v551_v62  ;;  %v571_v1 = vmul.f32 %v890_v8, %v1215_v47  ;;  %v595_v52 = vld [vmem:[%s1245_s28 + $0x50] sm:$0xff]  ;;  %v598_v62 = vld [vmem:[%s1245_s28 + $0x68] sm:$0xff]  ;;  %v597_v57 = vld [vmem:[%s1245_s28 + $0x60] sm:$0xff] }
  0x87   : > { %v548_v9 = vsel %vm547_vm6, %v886_v44, %v544_v3  ;;  %vm550_vm8 = vcmp.eq.f32.partialorder %v549_v63, 8.507059e+37  ;;  %vm530_vm9 = vweird.f32 %v1185_v23  ;;  %v537_v12 = vor.u32 1.1754944e-38, %v536_v7 }
  0x88   : > { %v529_v15 = vadd.f32 %v888_v18, %v528_v58  ;;  %v553_v17 = vsel %vm550_vm8, %v552_v14, %v548_v9  ;;  %vm532_vm10 = vmor %vm530_vm9, %vm531_vm7  ;;  %v572_v21 = vsub.f32 1.0, %v571_v1  ;;  %vm535_vm11 = vcmp.eq.f32.partialorder %v534_v13, 8.507059e+37 }
  0x89   : > { %673 = vperm.xlu2 %826, %v568_v0   ;;  %vm576_vm12 = vweird.f32 %v890_v8  ;;  %v581_v26 = vand.u32 2147483648, %v1215_v47  ;;  %vm575_vm13 = vweird.f32 %v1215_v47  ;;  %v579_v23 = vand.u32 2147483647, %v1215_v47 }
  0x8a   : > { %v533_v2 = vsel %vm532_vm10, %v888_v18, %v529_v15  ;;  %v573_v24 = vmul.f32 %v890_v8, %v572_v21  ;;  %vm577_vm14 = vmor %vm575_vm13, %vm576_vm12  ;;  %vm697_vm0 = vcmask 64512   ;;  %v592_v18 = vld [vmem:[%s1245_s28 + $0x38] sm:$0xff] }
  0x8b   : > { %v538_v22 = vsel %vm535_vm11, %v537_v12, %v533_v2  ;;  %v582_v4 = vor.u32 1.1754944e-38, %v581_v26  ;;  %vm580_vm15 = vcmp.eq.f32.partialorder %v579_v23, 8.507059e+37 }
  0x8c   : > { %668 = vperm.xlu1 %825, %v553_v17   ;;  %v574_v25 = vadd.f32 %v890_v8, %v573_v24 }
  0x8d   : > { %663 = vperm.xlu0 %824, %v538_v22  }
  0x8e   : > { %v578_v27 = vsel %vm577_vm14, %v890_v8, %v574_v25  ;;  %v600_v8 = vld [vmem:[%s1245_s28 + $0x78] sm:$0xff] }
  0x8f   : > { %v583_v28 = vsel %vm580_vm15, %v582_v4, %v578_v27 }
  0x95   : > { %678 = vperm.xlu0 %824, %v583_v28  }
  0xbc   : > { %v624_v30 = vpop.permute.xlu2 %623 }
  0xbd   : > { %v685_v31 = vmul.f32 %v624_v30, %v589_v29 }
  0xbf   : > { %702 = vst.msk [vmem:[%s1252_s5 + $0x20] sm:$0xff] %vm697_vm0, %v685_v31 }
  0xc4   : > { %v629_v32 = vpop.permute.xlu2 %628 }
  0xc5   : > { %v686_v33 = vmul.f32 %v629_v32, %v590_v16 }
  0xc7   : > { %703 = vst.msk [vmem:[%s1252_s5 + $0x28] sm:$0xff] %vm697_vm0, %v686_v33 }
  0xcc   : > { %v644_v35 = vpop.permute.xlu2 %643 }
  0xcd   : > { %v689_v36 = vmul.f32 %v644_v35, %v593_v34 }
  0xcf   : > { %706 = vst.msk [vmem:[%s1252_s5 + $0x40] sm:$0xff] %vm697_vm0, %v689_v36 }
  0xd5   : > { %v614_v37 = vpop.permute.xlu1 %613 }
  0xd6   : > { %v683_v38 = vmul.f32 %v614_v37, %v587_v5 }
  0xd8   : > { %700 = vst.msk [vmem:[%s1252_s5 + $0x10] sm:$0xff] %vm697_vm0, %v683_v38  ;;  %v604_v40 = vpop.permute.xlu0 %603 }
  0xd9   : > { %v681_v41 = vmul.f32 %v604_v40, %v585_v39 }
  0xdb   : > { %698 = vst.msk [vmem:[%s1252_s5] sm:$0xff] %vm697_vm0, %v681_v41  ;;  %v659_v6 = vpop.permute.xlu2 %658 }
  0xdc   : > { %v692_v44 = vmul.f32 %v659_v6, %v596_v42 }
  0xdd   : > { %v619_v20 = vpop.permute.xlu1 %618 }
  0xde   : > { %v684_v45 = vmul.f32 %v619_v20, %v588_v43  ;;  %709 = vst.msk [vmem:[%s1252_s5 + $0x58] sm:$0xff] %vm697_vm0, %v692_v44 }
  0xe0   : > { %v609_v46 = vpop.permute.xlu0 %608  ;;  %701 = vst.msk [vmem:[%s1252_s5 + $0x18] sm:$0xff] %vm697_vm0, %v684_v45 }
  0xe1   : > { %v682_v47 = vmul.f32 %v609_v46, %v586_v10 }
  0xe3   : > { %699 = vst.msk [vmem:[%s1252_s5 + $0x8] sm:$0xff] %vm697_vm0, %v682_v47  ;;  %v674_v49 = vpop.permute.xlu2 %673 }
  0xe4   : > { %v695_v50 = vmul.f32 %v674_v49, %v599_v48 }
  0xe5   : > { %v639_v53 = vpop.permute.xlu1 %638 }
  0xe6   : > { %712 = vst.msk [vmem:[%s1252_s5 + $0x70] sm:$0xff] %vm697_vm0, %v695_v50  ;;  %v688_v54 = vmul.f32 %v639_v53, %v592_v18 }
  0xe8   : > { %705 = vst.msk [vmem:[%s1252_s5 + $0x38] sm:$0xff] %vm697_vm0, %v688_v54  ;;  %v634_v56 = vpop.permute.xlu0 %633 }
  0xe9   : > { %v687_v59 = vmul.f32 %v634_v56, %v591_v55 }
  0xeb   : > { %704 = vst.msk [vmem:[%s1252_s5 + $0x30] sm:$0xff] %vm697_vm0, %v687_v59 }
  0xf6   : > { %v654_v60 = vpop.permute.xlu1 %653 }
  0xf7   : > { %v691_v19 = vmul.f32 %v654_v60, %v595_v52  ;;  %v649_v51 = vpop.permute.xlu0 %648 }
  0xf8   : > { %v690_v61 = vmul.f32 %v649_v51, %v594_v11 }
  0xf9   : > { %708 = vst.msk [vmem:[%s1252_s5 + $0x50] sm:$0xff] %vm697_vm0, %v691_v19 }
  0xfa   : > { %707 = vst.msk [vmem:[%s1252_s5 + $0x48] sm:$0xff] %vm697_vm0, %v690_v61 }
  0xfe   : > { %v669_v63 = vpop.permute.xlu1 %668 }
  0xff   : > { %v694_v0 = vmul.f32 %v669_v63, %v598_v62  ;;  %v664_v3 = vpop.permute.xlu0 %663 }
 0x100   : > { %v693_v7 = vmul.f32 %v664_v3, %v597_v57 }
 0x101   : > { %711 = vst.msk [vmem:[%s1252_s5 + $0x68] sm:$0xff] %vm697_vm0, %v694_v0 }
 0x102   : > { %710 = vst.msk [vmem:[%s1252_s5 + $0x60] sm:$0xff] %vm697_vm0, %v693_v7 }
 0x107   : > { %v679_v58 = vpop.permute.xlu0 %678 }
 0x108   : > { %v696_v13 = vmul.f32 %v679_v58, %v600_v8 }
 0x10a   : > { %713 = vst.msk [vmem:[%s1252_s5 + $0x78] sm:$0xff] %vm697_vm0, %v696_v13 }
 0x10b PF: > { %s18_s19 = sadd.s32 1, %s897_s19  }
 0x10c   : > { %p15_p4 = scmp.ge.s32.totalorder %s18_s19, 6  }
 0x10e   :  { %17 = sbr.rel (!%p15_p4) target bundleno = 4 (0x4), region = 69 }

</bundles_post_ra>
